<compile_context>
chip_gen: v6e
topology: v6e:2x2x1
jax: 0.10.0
libtpu: 0.0.40
codegen_flags: <defaults>
</compile_context>

<pallas_src>
import functools

import jax
import jax.numpy as jnp
from jax.experimental import pallas as pl
from jax.experimental.pallas import tpu as pltpu


# ---------------------------------------------------------------------------
# Primary path: pure HBM -> HBM DMA concat (no VMEM round trip, no grid).
# ---------------------------------------------------------------------------
def _cat_dma_kernel(dim, offsets, channels, ndim, *refs):
    """Issue one HBM->HBM async copy per input into its slice of the output."""
    n_in = len(channels)
    in_refs = refs[:n_in]
    out_ref = refs[n_in]
    sem = refs[n_in + 1]

    copies = []
    for i, (ref, off, c) in enumerate(zip(in_refs, offsets, channels)):
        idx = [slice(None)] * ndim
        idx[dim] = slice(off, off + c)          # static slice on a stride dim
        cp = pltpu.make_async_copy(ref, out_ref.at[tuple(idx)], sem.at[i])
        cp.start()
        copies.append(cp)
    for cp in copies:                            # all DMAs in flight; now drain
        cp.wait()


def pallas_cat_dma(inputs, dim):
    """Concatenate arrays along `dim` (dim <= ndim-3) via HBM->HBM DMAs."""
    ndim = inputs[0].ndim
    dtype = inputs[0].dtype
    channels = tuple(int(x.shape[dim]) for x in inputs)
    offsets, acc = [], 0
    for c in channels:
        offsets.append(acc)
        acc += c
    offsets = tuple(offsets)

    out_shape = list(inputs[0].shape)
    out_shape[dim] = acc
    out_shape = tuple(out_shape)

    itemsize = jnp.dtype(dtype).itemsize
    in_bytes = sum(int(x.size) for x in inputs) * itemsize
    n_in = len(inputs)

    kernel = functools.partial(_cat_dma_kernel, dim, offsets, channels, ndim)

    return pl.pallas_call(
        kernel,
        out_shape=jax.ShapeDtypeStruct(out_shape, dtype),
        in_specs=[pl.BlockSpec(memory_space=pl.ANY)] * n_in,
        out_specs=pl.BlockSpec(memory_space=pl.ANY),
        scratch_shapes=[pltpu.SemaphoreType.DMA((n_in,))],
        compiler_params=pltpu.CompilerParams(has_side_effects=True),
        cost_estimate=pl.CostEstimate(
            flops=0, transcendentals=0, bytes_accessed=2 * in_bytes),
    )(*inputs)


# ---------------------------------------------------------------------------
# Fallback path: BlockSpec/VMEM concat of NCHW arrays along dim=1.
# (Only used if the HBM->HBM DMA path fails to lower.)
# ---------------------------------------------------------------------------
def _is_multi_tc_chip():
    # v4/v5p (megacore) and v7x expose 2 TensorCores per device; v5e/v6e don't.
    try:
        kind = jax.devices()[0].device_kind.lower()
    except Exception:
        return False
    return ("v4" in kind) or ("v5p" in kind) or ("7" in kind)


def _rows_per_step(n_rows, padded_row_bytes, target_step_bytes, multi_tc):
    """Largest divisor of n_rows whose padded, double-buffered tile fits VMEM."""
    # Double-buffering ~doubles the footprint; keep a single step under 6 MiB
    # so 2x stays well inside v5e's 16 MiB scoped-VMEM default.
    budget = min(target_step_bytes, 6 << 20)
    cap = max(1, budget // max(1, padded_row_bytes))
    # Only force >=2 grid steps on multi-TC chips, where "parallel" sharding
    # actually buys bandwidth; on single-TC v5e/v6e it just shrinks the tile.
    if multi_tc and n_rows >= 2:
        cap = min(cap, max(1, n_rows // 2))
    best = 1
    for d in range(1, n_rows + 1):
        if n_rows % d == 0 and d <= cap:
            best = d
    return best


def _cat_vmem_kernel(offsets, channels, *refs):
    in_refs = refs[:-1]
    out_ref = refs[-1]
    for ref, off, c in zip(in_refs, offsets, channels):
        out_ref[:, off:off + c, :] = ref[...]


def pallas_cat_channels_blockspec(inputs, *, target_step_bytes=4 << 20):
    """Concatenate NCHW arrays along dim=1 through VMEM tiles (fallback)."""
    N, _, H, W = inputs[0].shape
    dtype = inputs[0].dtype
    channels = tuple(int(x.shape[1]) for x in inputs)
    offsets, acc = [], 0
    for c in channels:
        offsets.append(acc)
        acc += c
    offsets = tuple(offsets)
    c_out = acc
    hw = H * W

    # Lane-dense view: (N, C, H*W) — pure trailing-dim merge.
    flat = [x.reshape(N, c, hw) for x, c in zip(inputs, channels)]

    itemsize = jnp.dtype(dtype).itemsize
    # Size steps against the *padded* VMEM footprint: sublanes pad to 8/16/32
    # for 4/2/1-byte dtypes, lanes pad to 128.
    pack = 8 * max(1, 4 // itemsize)
    hw_pad = -(-hw // 128) * 128
    pad_bytes = lambda c: (-(-c // pack) * pack) * hw_pad * itemsize
    padded_row_bytes = sum(pad_bytes(c) for c in channels) + pad_bytes(c_out)

    nb = _rows_per_step(N, padded_row_bytes, target_step_bytes,
                        _is_multi_tc_chip())
    grid = (N // nb,)

    total_bytes = (sum(int(x.size) for x in inputs) + N * c_out * hw) * itemsize
    kernel = functools.partial(_cat_vmem_kernel, offsets, channels)

    # Last two block dims equal the full array dims -> always layout-legal.
    in_specs = [pl.BlockSpec((nb, c, hw), lambda n: (n, 0, 0)) for c in channels]
    out_spec = pl.BlockSpec((nb, c_out, hw), lambda n: (n, 0, 0))

    out = pl.pallas_call(
        kernel,
        out_shape=jax.ShapeDtypeStruct((N, c_out, hw), dtype),
        grid_spec=pltpu.PrefetchScalarGridSpec(
            num_scalar_prefetch=0,
            grid=grid,
            in_specs=in_specs,
            out_specs=out_spec,
        ),
        compiler_params=pltpu.CompilerParams(
            dimension_semantics=("parallel",),
        ),
        cost_estimate=pl.CostEstimate(
            flops=0, transcendentals=0, bytes_accessed=total_bytes),
    )(*flat)
    return out.reshape(N, c_out, H, W)


# ---------------------------------------------------------------------------
# Module wrapper (JAX/Pallas port of cassetta.layers.simple.Cat).
# ---------------------------------------------------------------------------
class Cat:
    """Concatenate tensors along `dim` (default 1, the channel dimension)."""

    def __init__(self, dim=1, min_pallas_bytes=64 * 1024):
        self.dim = dim
        self.min_pallas_bytes = min_pallas_bytes

    def __call__(self, *inputs):
        if len(inputs) == 0:
            raise ValueError("Cat needs at least one input")
        if len(inputs) == 1:
            return inputs[0]                      # no-op concat: no HBM round trip

        x0 = inputs[0]
        ndim = x0.ndim
        d = self.dim if self.dim >= 0 else self.dim + ndim
        dtype = x0.dtype
        compatible = (
            0 <= d < ndim
            and all(x.ndim == ndim and x.dtype == dtype for x in inputs)
            and all(
                x.shape[i] == x0.shape[i]
                for x in inputs for i in range(ndim) if i != d
            )
        )
        if compatible:
            parts = [x for x in inputs if x.shape[d] > 0]
            if len(parts) == 1:
                return parts[0]
            itemsize = jnp.dtype(dtype).itemsize
            total_bytes = sum(int(x.size) for x in parts) * itemsize
            if (
                len(parts) >= 2
                and d <= ndim - 3                 # concat above the tiled (8,128) dims
                and total_bytes >= self.min_pallas_bytes
            ):
                try:
                    return pallas_cat_dma(parts, d)
                except Exception:
                    pass                          # fall through to VMEM kernel
                if ndim == 4 and d == 1:
                    try:
                        return pallas_cat_channels_blockspec(parts)
                    except Exception:
                        pass
        # TODO(synk): non-channel / lane-dim / tiny concats use XLA's native
        # concatenate, which is already DMA-lowered and optimal at small sizes.
        return jnp.concatenate(inputs, axis=self.dim)


if __name__ == "__main__":
    key = jax.random.PRNGKey(0)
    k1, k2, k3, k4, k5, k6, k7 = jax.random.split(key, 7)

    # --- Case 1: small NCHW f32 inputs, Pallas path forced (threshold 0). ---
    x1 = jax.random.normal(k1, (2, 4, 16, 16), dtype=jnp.float32)
    x2 = jax.random.normal(k2, (2, 6, 16, 16), dtype=jnp.float32)
    x3 = jax.random.normal(k3, (2, 2, 16, 16), dtype=jnp.float32)
    ref = jnp.concatenate([x1, x2, x3], axis=1)

    out = jax.block_until_ready(Cat(dim=1, min_pallas_bytes=0)(x1, x2, x3))
    assert out.shape == (2, 12, 16, 16), out.shape
    assert out.dtype == ref.dtype
    assert jnp.array_equal(out, ref)

    # --- Case 2: same tiny inputs through default Cat (jnp fallback path). ---
    out_small = jax.block_until_ready(Cat(dim=1)(x1, x2, x3))
    assert jnp.array_equal(out_small, ref)

    # --- Case 3: larger inputs; default Cat takes the Pallas DMA path. ---
    y1 = jax.random.normal(k4, (8, 16, 32, 32), dtype=jnp.float32)
    y2 = jax.random.normal(k5, (8, 8, 32, 32), dtype=jnp.float32)
    out_big = jax.block_until_ready(Cat(dim=1)(y1, y2))
    ref_big = jnp.concatenate([y1, y2], axis=1)
    assert out_big.shape == (8, 24, 32, 32), out_big.shape
    assert jnp.array_equal(out_big, ref_big)

    # --- Case 4: bf16 inputs with odd channel counts (dtype robustness). ---
    z1 = jax.random.normal(k6, (2, 3, 16, 16)).astype(jnp.bfloat16)
    z2 = jax.random.normal(k7, (2, 5, 16, 16)).astype(jnp.bfloat16)
    out_bf = jax.block_until_ready(Cat(dim=1, min_pallas_bytes=0)(z1, z2))
    ref_bf = jnp.concatenate([z1, z2], axis=1)
    assert out_bf.shape == (2, 8, 16, 16) and out_bf.dtype == jnp.bfloat16
    assert jnp.array_equal(out_bf, ref_bf)

    # --- Case 5: exercise the BlockSpec/VMEM fallback kernel directly. ---
    out_fb = jax.block_until_ready(pallas_cat_channels_blockspec([x1, x2, x3]))
    assert jnp.array_equal(out_fb, ref)

    # --- Case 6: single-input concat is a no-op passthrough. ---
    out_one = jax.block_until_ready(Cat(dim=1)(x1))
    assert jnp.array_equal(out_one, x1)

    print("KERNEL_OK")
</pallas_src>

<mosaic_0001>
module attributes {stable_mosaic.version = 11 : i64} {
  func.func @_cat_dma_kernel(%arg0: memref<2x4x16x16xf32, #tpu.memory_space<any>>, %arg1: memref<2x6x16x16xf32, #tpu.memory_space<any>>, %arg2: memref<2x2x16x16xf32, #tpu.memory_space<any>>, %arg3: memref<2x12x16x16xf32, #tpu.memory_space<any>>, %arg4: memref<3x!tpu.dma_semaphore, #tpu.memory_space<semaphore_mem>>) attributes {dimension_semantics = [], scalar_prefetch = 0 : i64, scratch_operands = 1 : i64, tpu.core_type = #tpu.core_type<tc>} {
    %c0_i32 = arith.constant 0 : i32
    %c0_i32_0 = arith.constant 0 : i32
    %c0_i32_1 = arith.constant 0 : i32
    %c0_i32_2 = arith.constant 0 : i32
    %c0_i32_3 = arith.constant 0 : i32
    %0 = tpu.memref_slice %arg3[%c0_i32_0, %c0_i32_1, %c0_i32_2, %c0_i32_3] : memref<2x12x16x16xf32, #tpu.memory_space<any>> -> memref<2x4x16x16xf32, #tpu.memory_space<any>>
    %1 = tpu.memref_slice %arg4[%c0_i32] : memref<3x!tpu.dma_semaphore, #tpu.memory_space<semaphore_mem>> -> memref<1x!tpu.dma_semaphore, #tpu.memory_space<semaphore_mem>>
    %2 = tpu.memref_squeeze %1 : memref<1x!tpu.dma_semaphore, #tpu.memory_space<semaphore_mem>> -> memref<!tpu.dma_semaphore, #tpu.memory_space<semaphore_mem>>
    tpu.enqueue_dma source(%arg0 : memref<2x4x16x16xf32, #tpu.memory_space<any>>) target(%0 : memref<2x4x16x16xf32, #tpu.memory_space<any>>) target_semaphore(%2 : memref<!tpu.dma_semaphore, #tpu.memory_space<semaphore_mem>>)
    %c1_i32 = arith.constant 1 : i32
    %c0_i32_4 = arith.constant 0 : i32
    %c4_i32 = arith.constant 4 : i32
    %c0_i32_5 = arith.constant 0 : i32
    %c0_i32_6 = arith.constant 0 : i32
    %3 = tpu.memref_slice %arg3[%c0_i32_4, %c4_i32, %c0_i32_5, %c0_i32_6] : memref<2x12x16x16xf32, #tpu.memory_space<any>> -> memref<2x6x16x16xf32, #tpu.memory_space<any>>
    %4 = tpu.memref_slice %arg4[%c1_i32] : memref<3x!tpu.dma_semaphore, #tpu.memory_space<semaphore_mem>> -> memref<1x!tpu.dma_semaphore, #tpu.memory_space<semaphore_mem>>
    %5 = tpu.memref_squeeze %4 : memref<1x!tpu.dma_semaphore, #tpu.memory_space<semaphore_mem>> -> memref<!tpu.dma_semaphore, #tpu.memory_space<semaphore_mem>>
    tpu.enqueue_dma source(%arg1 : memref<2x6x16x16xf32, #tpu.memory_space<any>>) target(%3 : memref<2x6x16x16xf32, #tpu.memory_space<any>>) target_semaphore(%5 : memref<!tpu.dma_semaphore, #tpu.memory_space<semaphore_mem>>)
    %c2_i32 = arith.constant 2 : i32
    %c0_i32_7 = arith.constant 0 : i32
    %c10_i32 = arith.constant 10 : i32
    %c0_i32_8 = arith.constant 0 : i32
    %c0_i32_9 = arith.constant 0 : i32
    %6 = tpu.memref_slice %arg3[%c0_i32_7, %c10_i32, %c0_i32_8, %c0_i32_9] : memref<2x12x16x16xf32, #tpu.memory_space<any>> -> memref<2x2x16x16xf32, #tpu.memory_space<any>>
    %7 = tpu.memref_slice %arg4[%c2_i32] : memref<3x!tpu.dma_semaphore, #tpu.memory_space<semaphore_mem>> -> memref<1x!tpu.dma_semaphore, #tpu.memory_space<semaphore_mem>>
    %8 = tpu.memref_squeeze %7 : memref<1x!tpu.dma_semaphore, #tpu.memory_space<semaphore_mem>> -> memref<!tpu.dma_semaphore, #tpu.memory_space<semaphore_mem>>
    tpu.enqueue_dma source(%arg2 : memref<2x2x16x16xf32, #tpu.memory_space<any>>) target(%6 : memref<2x2x16x16xf32, #tpu.memory_space<any>>) target_semaphore(%8 : memref<!tpu.dma_semaphore, #tpu.memory_space<semaphore_mem>>)
    %c0_i32_10 = arith.constant 0 : i32
    %c0_i32_11 = arith.constant 0 : i32
    %c0_i32_12 = arith.constant 0 : i32
    %c0_i32_13 = arith.constant 0 : i32
    %c0_i32_14 = arith.constant 0 : i32
    %9 = tpu.memref_slice %arg3[%c0_i32_11, %c0_i32_12, %c0_i32_13, %c0_i32_14] : memref<2x12x16x16xf32, #tpu.memory_space<any>> -> memref<2x4x16x16xf32, #tpu.memory_space<any>>
    %10 = tpu.memref_slice %arg4[%c0_i32_10] : memref<3x!tpu.dma_semaphore, #tpu.memory_space<semaphore_mem>> -> memref<1x!tpu.dma_semaphore, #tpu.memory_space<semaphore_mem>>
    %11 = tpu.memref_squeeze %10 : memref<1x!tpu.dma_semaphore, #tpu.memory_space<semaphore_mem>> -> memref<!tpu.dma_semaphore, #tpu.memory_space<semaphore_mem>>
    tpu.wait_dma2 semaphore(%11 : memref<!tpu.dma_semaphore, #tpu.memory_space<semaphore_mem>>) src(%arg0 : memref<2x4x16x16xf32, #tpu.memory_space<any>>) dst(%9 : memref<2x4x16x16xf32, #tpu.memory_space<any>>)
    %c1_i32_15 = arith.constant 1 : i32
    %c0_i32_16 = arith.constant 0 : i32
    %c4_i32_17 = arith.constant 4 : i32
    %c0_i32_18 = arith.constant 0 : i32
    %c0_i32_19 = arith.constant 0 : i32
    %12 = tpu.memref_slice %arg3[%c0_i32_16, %c4_i32_17, %c0_i32_18, %c0_i32_19] : memref<2x12x16x16xf32, #tpu.memory_space<any>> -> memref<2x6x16x16xf32, #tpu.memory_space<any>>
    %13 = tpu.memref_slice %arg4[%c1_i32_15] : memref<3x!tpu.dma_semaphore, #tpu.memory_space<semaphore_mem>> -> memref<1x!tpu.dma_semaphore, #tpu.memory_space<semaphore_mem>>
    %14 = tpu.memref_squeeze %13 : memref<1x!tpu.dma_semaphore, #tpu.memory_space<semaphore_mem>> -> memref<!tpu.dma_semaphore, #tpu.memory_space<semaphore_mem>>
    tpu.wait_dma2 semaphore(%14 : memref<!tpu.dma_semaphore, #tpu.memory_space<semaphore_mem>>) src(%arg1 : memref<2x6x16x16xf32, #tpu.memory_space<any>>) dst(%12 : memref<2x6x16x16xf32, #tpu.memory_space<any>>)
    %c2_i32_20 = arith.constant 2 : i32
    %c0_i32_21 = arith.constant 0 : i32
    %c10_i32_22 = arith.constant 10 : i32
    %c0_i32_23 = arith.constant 0 : i32
    %c0_i32_24 = arith.constant 0 : i32
    %15 = tpu.memref_slice %arg3[%c0_i32_21, %c10_i32_22, %c0_i32_23, %c0_i32_24] : memref<2x12x16x16xf32, #tpu.memory_space<any>> -> memref<2x2x16x16xf32, #tpu.memory_space<any>>
    %16 = tpu.memref_slice %arg4[%c2_i32_20] : memref<3x!tpu.dma_semaphore, #tpu.memory_space<semaphore_mem>> -> memref<1x!tpu.dma_semaphore, #tpu.memory_space<semaphore_mem>>
    %17 = tpu.memref_squeeze %16 : memref<1x!tpu.dma_semaphore, #tpu.memory_space<semaphore_mem>> -> memref<!tpu.dma_semaphore, #tpu.memory_space<semaphore_mem>>
    tpu.wait_dma2 semaphore(%17 : memref<!tpu.dma_semaphore, #tpu.memory_space<semaphore_mem>>) src(%arg2 : memref<2x2x16x16xf32, #tpu.memory_space<any>>) dst(%15 : memref<2x2x16x16xf32, #tpu.memory_space<any>>)
    return
  }
}

module attributes {stable_mosaic.version = 11 : i64} {
  func.func @_cat_vmem_kernel(%arg0: i32, %arg1: memref<2x4x256xf32, #tpu.memory_space<vmem>>, %arg2: memref<2x6x256xf32, #tpu.memory_space<vmem>>, %arg3: memref<2x2x256xf32, #tpu.memory_space<vmem>>, %arg4: memref<2x12x256xf32, #tpu.memory_space<vmem>>) attributes {dimension_semantics = [#tpu.dimension_semantics<parallel>], iteration_bounds = array<i64: 1>, scalar_prefetch = 0 : i64, scratch_operands = 0 : i64, tpu.core_type = #tpu.core_type<tc>, window_params = [{transform_indices = @transform_0, window_bounds = array<i64: 2, 4, 256>}, {transform_indices = @transform_1, window_bounds = array<i64: 2, 6, 256>}, {transform_indices = @transform_2, window_bounds = array<i64: 2, 2, 256>}, {transform_indices = @transform_3, window_bounds = array<i64: 2, 12, 256>}]} {
    %c0 = arith.constant 0 : index
    %c0_0 = arith.constant 0 : index
    %c0_1 = arith.constant 0 : index
    %0 = vector.load %arg1[%c0, %c0_0, %c0_1] : memref<2x4x256xf32, #tpu.memory_space<vmem>>, vector<2x4x256xf32>
    %c0_2 = arith.constant 0 : index
    %c0_3 = arith.constant 0 : index
    %c0_4 = arith.constant 0 : index
    %1 = vector.load %arg4[%c0_2, %c0_3, %c0_4] : memref<2x12x256xf32, #tpu.memory_space<vmem>>, vector<2x4x256xf32>
    tpu.vector_store %arg4[%c0_2, %c0_3, %c0_4], %0 {strides = array<i32>} : memref<2x12x256xf32, #tpu.memory_space<vmem>>, vector<2x4x256xf32>,
    %c0_5 = arith.constant 0 : index
    %c0_6 = arith.constant 0 : index
    %c0_7 = arith.constant 0 : index
    %2 = vector.load %arg2[%c0_5, %c0_6, %c0_7] : memref<2x6x256xf32, #tpu.memory_space<vmem>>, vector<2x6x256xf32>
    %c0_8 = arith.constant 0 : index
    %c4 = arith.constant 4 : index
    %c0_9 = arith.constant 0 : index
    %3 = vector.load %arg4[%c0_8, %c4, %c0_9] : memref<2x12x256xf32, #tpu.memory_space<vmem>>, vector<2x6x256xf32>
    tpu.vector_store %arg4[%c0_8, %c4, %c0_9], %2 {strides = array<i32>} : memref<2x12x256xf32, #tpu.memory_space<vmem>>, vector<2x6x256xf32>,
    %c0_10 = arith.constant 0 : index
    %c0_11 = arith.constant 0 : index
    %c0_12 = arith.constant 0 : index
    %4 = vector.load %arg3[%c0_10, %c0_11, %c0_12] : memref<2x2x256xf32, #tpu.memory_space<vmem>>, vector<2x2x256xf32>
    %c0_13 = arith.constant 0 : index
    %c10 = arith.constant 10 : index
    %c0_14 = arith.constant 0 : index
    %5 = vector.load %arg4[%c0_13, %c10, %c0_14] : memref<2x12x256xf32, #tpu.memory_space<vmem>>, vector<2x2x256xf32>
    tpu.vector_store %arg4[%c0_13, %c10, %c0_14], %4 {strides = array<i32>} : memref<2x12x256xf32, #tpu.memory_space<vmem>>, vector<2x2x256xf32>,
    return
  }
  func.func @transform_0(%arg0: i32) -> (i32, i32, i32) {
    %c0_i32 = arith.constant 0 : i32
    %c0_i32_0 = arith.constant 0 : i32
    %c0_i32_1 = arith.constant 0 : i32
    return %arg0, %c0_i32, %c0_i32_0 : i32, i32, i32
  }
  func.func @transform_1(%arg0: i32) -> (i32, i32, i32) {
    %c0_i32 = arith.constant 0 : i32
    %c0_i32_0 = arith.constant 0 : i32
    %c0_i32_1 = arith.constant 0 : i32
    return %arg0, %c0_i32, %c0_i32_0 : i32, i32, i32
  }
  func.func @transform_2(%arg0: i32) -> (i32, i32, i32) {
    %c0_i32 = arith.constant 0 : i32
    %c0_i32_0 = arith.constant 0 : i32
    %c0_i32_1 = arith.constant 0 : i32
    return %arg0, %c0_i32, %c0_i32_0 : i32, i32, i32
  }
  func.func @transform_3(%arg0: i32) -> (i32, i32, i32) {
    %c0_i32 = arith.constant 0 : i32
    %c0_i32_0 = arith.constant 0 : i32
    %c0_i32_1 = arith.constant 0 : i32
    return %arg0, %c0_i32, %c0_i32_0 : i32, i32, i32
  }
}

module attributes {stable_mosaic.version = 11 : i64} {
  func.func @_cat_dma_kernel(%arg0: memref<8x16x32x32xf32, #tpu.memory_space<any>>, %arg1: memref<8x8x32x32xf32, #tpu.memory_space<any>>, %arg2: memref<8x24x32x32xf32, #tpu.memory_space<any>>, %arg3: memref<2x!tpu.dma_semaphore, #tpu.memory_space<semaphore_mem>>) attributes {dimension_semantics = [], scalar_prefetch = 0 : i64, scratch_operands = 1 : i64, tpu.core_type = #tpu.core_type<tc>} {
    %c0_i32 = arith.constant 0 : i32
    %c0_i32_0 = arith.constant 0 : i32
    %c0_i32_1 = arith.constant 0 : i32
    %c0_i32_2 = arith.constant 0 : i32
    %c0_i32_3 = arith.constant 0 : i32
    %0 = tpu.memref_slice %arg2[%c0_i32_0, %c0_i32_1, %c0_i32_2, %c0_i32_3] : memref<8x24x32x32xf32, #tpu.memory_space<any>> -> memref<8x16x32x32xf32, #tpu.memory_space<any>>
    %1 = tpu.memref_slice %arg3[%c0_i32] : memref<2x!tpu.dma_semaphore, #tpu.memory_space<semaphore_mem>> -> memref<1x!tpu.dma_semaphore, #tpu.memory_space<semaphore_mem>>
    %2 = tpu.memref_squeeze %1 : memref<1x!tpu.dma_semaphore, #tpu.memory_space<semaphore_mem>> -> memref<!tpu.dma_semaphore, #tpu.memory_space<semaphore_mem>>
    tpu.enqueue_dma source(%arg0 : memref<8x16x32x32xf32, #tpu.memory_space<any>>) target(%0 : memref<8x16x32x32xf32, #tpu.memory_space<any>>) target_semaphore(%2 : memref<!tpu.dma_semaphore, #tpu.memory_space<semaphore_mem>>)
    %c1_i32 = arith.constant 1 : i32
    %c0_i32_4 = arith.constant 0 : i32
    %c16_i32 = arith.constant 16 : i32
    %c0_i32_5 = arith.constant 0 : i32
    %c0_i32_6 = arith.constant 0 : i32
    %3 = tpu.memref_slice %arg2[%c0_i32_4, %c16_i32, %c0_i32_5, %c0_i32_6] : memref<8x24x32x32xf32, #tpu.memory_space<any>> -> memref<8x8x32x32xf32, #tpu.memory_space<any>>
    %4 = tpu.memref_slice %arg3[%c1_i32] : memref<2x!tpu.dma_semaphore, #tpu.memory_space<semaphore_mem>> -> memref<1x!tpu.dma_semaphore, #tpu.memory_space<semaphore_mem>>
    %5 = tpu.memref_squeeze %4 : memref<1x!tpu.dma_semaphore, #tpu.memory_space<semaphore_mem>> -> memref<!tpu.dma_semaphore, #tpu.memory_space<semaphore_mem>>
    tpu.enqueue_dma source(%arg1 : memref<8x8x32x32xf32, #tpu.memory_space<any>>) target(%3 : memref<8x8x32x32xf32, #tpu.memory_space<any>>) target_semaphore(%5 : memref<!tpu.dma_semaphore, #tpu.memory_space<semaphore_mem>>)
    %c0_i32_7 = arith.constant 0 : i32
    %c0_i32_8 = arith.constant 0 : i32
    %c0_i32_9 = arith.constant 0 : i32
    %c0_i32_10 = arith.constant 0 : i32
    %c0_i32_11 = arith.constant 0 : i32
    %6 = tpu.memref_slice %arg2[%c0_i32_8, %c0_i32_9, %c0_i32_10, %c0_i32_11] : memref<8x24x32x32xf32, #tpu.memory_space<any>> -> memref<8x16x32x32xf32, #tpu.memory_space<any>>
    %7 = tpu.memref_slice %arg3[%c0_i32_7] : memref<2x!tpu.dma_semaphore, #tpu.memory_space<semaphore_mem>> -> memref<1x!tpu.dma_semaphore, #tpu.memory_space<semaphore_mem>>
    %8 = tpu.memref_squeeze %7 : memref<1x!tpu.dma_semaphore, #tpu.memory_space<semaphore_mem>> -> memref<!tpu.dma_semaphore, #tpu.memory_space<semaphore_mem>>
    tpu.wait_dma2 semaphore(%8 : memref<!tpu.dma_semaphore, #tpu.memory_space<semaphore_mem>>) src(%arg0 : memref<8x16x32x32xf32, #tpu.memory_space<any>>) dst(%6 : memref<8x16x32x32xf32, #tpu.memory_space<any>>)
    %c1_i32_12 = arith.constant 1 : i32
    %c0_i32_13 = arith.constant 0 : i32
    %c16_i32_14 = arith.constant 16 : i32
    %c0_i32_15 = arith.constant 0 : i32
    %c0_i32_16 = arith.constant 0 : i32
    %9 = tpu.memref_slice %arg2[%c0_i32_13, %c16_i32_14, %c0_i32_15, %c0_i32_16] : memref<8x24x32x32xf32, #tpu.memory_space<any>> -> memref<8x8x32x32xf32, #tpu.memory_space<any>>
    %10 = tpu.memref_slice %arg3[%c1_i32_12] : memref<2x!tpu.dma_semaphore, #tpu.memory_space<semaphore_mem>> -> memref<1x!tpu.dma_semaphore, #tpu.memory_space<semaphore_mem>>
    %11 = tpu.memref_squeeze %10 : memref<1x!tpu.dma_semaphore, #tpu.memory_space<semaphore_mem>> -> memref<!tpu.dma_semaphore, #tpu.memory_space<semaphore_mem>>
    tpu.wait_dma2 semaphore(%11 : memref<!tpu.dma_semaphore, #tpu.memory_space<semaphore_mem>>) src(%arg1 : memref<8x8x32x32xf32, #tpu.memory_space<any>>) dst(%9 : memref<8x8x32x32xf32, #tpu.memory_space<any>>)
    return
  }
}

module attributes {stable_mosaic.version = 11 : i64} {
  func.func @_cat_vmem_kernel(%arg0: i32, %arg1: memref<8x16x1024xf32, #tpu.memory_space<vmem>>, %arg2: memref<8x8x1024xf32, #tpu.memory_space<vmem>>, %arg3: memref<8x24x1024xf32, #tpu.memory_space<vmem>>) attributes {dimension_semantics = [#tpu.dimension_semantics<parallel>], iteration_bounds = array<i64: 1>, scalar_prefetch = 0 : i64, scratch_operands = 0 : i64, tpu.core_type = #tpu.core_type<tc>, window_params = [{transform_indices = @transform_0, window_bounds = array<i64: 8, 16, 1024>}, {transform_indices = @transform_1, window_bounds = array<i64: 8, 8, 1024>}, {transform_indices = @transform_2, window_bounds = array<i64: 8, 24, 1024>}]} {
    %c0 = arith.constant 0 : index
    %c0_0 = arith.constant 0 : index
    %c0_1 = arith.constant 0 : index
    %0 = vector.load %arg1[%c0, %c0_0, %c0_1] : memref<8x16x1024xf32, #tpu.memory_space<vmem>>, vector<8x16x1024xf32>
    %c0_2 = arith.constant 0 : index
    %c0_3 = arith.constant 0 : index
    %c0_4 = arith.constant 0 : index
    %1 = vector.load %arg3[%c0_2, %c0_3, %c0_4] : memref<8x24x1024xf32, #tpu.memory_space<vmem>>, vector<8x16x1024xf32>
    tpu.vector_store %arg3[%c0_2, %c0_3, %c0_4], %0 {strides = array<i32>} : memref<8x24x1024xf32, #tpu.memory_space<vmem>>, vector<8x16x1024xf32>,
    %c0_5 = arith.constant 0 : index
    %c0_6 = arith.constant 0 : index
    %c0_7 = arith.constant 0 : index
    %2 = vector.load %arg2[%c0_5, %c0_6, %c0_7] : memref<8x8x1024xf32, #tpu.memory_space<vmem>>, vector<8x8x1024xf32>
    %c0_8 = arith.constant 0 : index
    %c16 = arith.constant 16 : index
    %c0_9 = arith.constant 0 : index
    %3 = vector.load %arg3[%c0_8, %c16, %c0_9] : memref<8x24x1024xf32, #tpu.memory_space<vmem>>, vector<8x8x1024xf32>
    tpu.vector_store %arg3[%c0_8, %c16, %c0_9], %2 {strides = array<i32>} : memref<8x24x1024xf32, #tpu.memory_space<vmem>>, vector<8x8x1024xf32>,
    return
  }
  func.func @transform_0(%arg0: i32) -> (i32, i32, i32) {
    %c0_i32 = arith.constant 0 : i32
    %c0_i32_0 = arith.constant 0 : i32
    %c0_i32_1 = arith.constant 0 : i32
    return %arg0, %c0_i32, %c0_i32_0 : i32, i32, i32
  }
  func.func @transform_1(%arg0: i32) -> (i32, i32, i32) {
    %c0_i32 = arith.constant 0 : i32
    %c0_i32_0 = arith.constant 0 : i32
    %c0_i32_1 = arith.constant 0 : i32
    return %arg0, %c0_i32, %c0_i32_0 : i32, i32, i32
  }
  func.func @transform_2(%arg0: i32) -> (i32, i32, i32) {
    %c0_i32 = arith.constant 0 : i32
    %c0_i32_0 = arith.constant 0 : i32
    %c0_i32_1 = arith.constant 0 : i32
    return %arg0, %c0_i32, %c0_i32_0 : i32, i32, i32
  }
}

module attributes {stable_mosaic.version = 11 : i64} {
  func.func @_cat_dma_kernel(%arg0: memref<2x3x16x16xbf16, #tpu.memory_space<any>>, %arg1: memref<2x5x16x16xbf16, #tpu.memory_space<any>>, %arg2: memref<2x8x16x16xbf16, #tpu.memory_space<any>>, %arg3: memref<2x!tpu.dma_semaphore, #tpu.memory_space<semaphore_mem>>) attributes {dimension_semantics = [], scalar_prefetch = 0 : i64, scratch_operands = 1 : i64, tpu.core_type = #tpu.core_type<tc>} {
    %c0_i32 = arith.constant 0 : i32
    %c0_i32_0 = arith.constant 0 : i32
    %c0_i32_1 = arith.constant 0 : i32
    %c0_i32_2 = arith.constant 0 : i32
    %c0_i32_3 = arith.constant 0 : i32
    %0 = tpu.memref_slice %arg2[%c0_i32_0, %c0_i32_1, %c0_i32_2, %c0_i32_3] : memref<2x8x16x16xbf16, #tpu.memory_space<any>> -> memref<2x3x16x16xbf16, #tpu.memory_space<any>>
    %1 = tpu.memref_slice %arg3[%c0_i32] : memref<2x!tpu.dma_semaphore, #tpu.memory_space<semaphore_mem>> -> memref<1x!tpu.dma_semaphore, #tpu.memory_space<semaphore_mem>>
    %2 = tpu.memref_squeeze %1 : memref<1x!tpu.dma_semaphore, #tpu.memory_space<semaphore_mem>> -> memref<!tpu.dma_semaphore, #tpu.memory_space<semaphore_mem>>
    tpu.enqueue_dma source(%arg0 : memref<2x3x16x16xbf16, #tpu.memory_space<any>>) target(%0 : memref<2x3x16x16xbf16, #tpu.memory_space<any>>) target_semaphore(%2 : memref<!tpu.dma_semaphore, #tpu.memory_space<semaphore_mem>>)
    %c1_i32 = arith.constant 1 : i32
    %c0_i32_4 = arith.constant 0 : i32
    %c3_i32 = arith.constant 3 : i32
    %c0_i32_5 = arith.constant 0 : i32
    %c0_i32_6 = arith.constant 0 : i32
    %3 = tpu.memref_slice %arg2[%c0_i32_4, %c3_i32, %c0_i32_5, %c0_i32_6] : memref<2x8x16x16xbf16, #tpu.memory_space<any>> -> memref<2x5x16x16xbf16, #tpu.memory_space<any>>
    %4 = tpu.memref_slice %arg3[%c1_i32] : memref<2x!tpu.dma_semaphore, #tpu.memory_space<semaphore_mem>> -> memref<1x!tpu.dma_semaphore, #tpu.memory_space<semaphore_mem>>
    %5 = tpu.memref_squeeze %4 : memref<1x!tpu.dma_semaphore, #tpu.memory_space<semaphore_mem>> -> memref<!tpu.dma_semaphore, #tpu.memory_space<semaphore_mem>>
    tpu.enqueue_dma source(%arg1 : memref<2x5x16x16xbf16, #tpu.memory_space<any>>) target(%3 : memref<2x5x16x16xbf16, #tpu.memory_space<any>>) target_semaphore(%5 : memref<!tpu.dma_semaphore, #tpu.memory_space<semaphore_mem>>)
    %c0_i32_7 = arith.constant 0 : i32
    %c0_i32_8 = arith.constant 0 : i32
    %c0_i32_9 = arith.constant 0 : i32
    %c0_i32_10 = arith.constant 0 : i32
    %c0_i32_11 = arith.constant 0 : i32
    %6 = tpu.memref_slice %arg2[%c0_i32_8, %c0_i32_9, %c0_i32_10, %c0_i32_11] : memref<2x8x16x16xbf16, #tpu.memory_space<any>> -> memref<2x3x16x16xbf16, #tpu.memory_space<any>>
    %7 = tpu.memref_slice %arg3[%c0_i32_7] : memref<2x!tpu.dma_semaphore, #tpu.memory_space<semaphore_mem>> -> memref<1x!tpu.dma_semaphore, #tpu.memory_space<semaphore_mem>>
    %8 = tpu.memref_squeeze %7 : memref<1x!tpu.dma_semaphore, #tpu.memory_space<semaphore_mem>> -> memref<!tpu.dma_semaphore, #tpu.memory_space<semaphore_mem>>
    tpu.wait_dma2 semaphore(%8 : memref<!tpu.dma_semaphore, #tpu.memory_space<semaphore_mem>>) src(%arg0 : memref<2x3x16x16xbf16, #tpu.memory_space<any>>) dst(%6 : memref<2x3x16x16xbf16, #tpu.memory_space<any>>)
    %c1_i32_12 = arith.constant 1 : i32
    %c0_i32_13 = arith.constant 0 : i32
    %c3_i32_14 = arith.constant 3 : i32
    %c0_i32_15 = arith.constant 0 : i32
    %c0_i32_16 = arith.constant 0 : i32
    %9 = tpu.memref_slice %arg2[%c0_i32_13, %c3_i32_14, %c0_i32_15, %c0_i32_16] : memref<2x8x16x16xbf16, #tpu.memory_space<any>> -> memref<2x5x16x16xbf16, #tpu.memory_space<any>>
    %10 = tpu.memref_slice %arg3[%c1_i32_12] : memref<2x!tpu.dma_semaphore, #tpu.memory_space<semaphore_mem>> -> memref<1x!tpu.dma_semaphore, #tpu.memory_space<semaphore_mem>>
    %11 = tpu.memref_squeeze %10 : memref<1x!tpu.dma_semaphore, #tpu.memory_space<semaphore_mem>> -> memref<!tpu.dma_semaphore, #tpu.memory_space<semaphore_mem>>
    tpu.wait_dma2 semaphore(%11 : memref<!tpu.dma_semaphore, #tpu.memory_space<semaphore_mem>>) src(%arg1 : memref<2x5x16x16xbf16, #tpu.memory_space<any>>) dst(%9 : memref<2x5x16x16xbf16, #tpu.memory_space<any>>)
    return
  }
}

module attributes {stable_mosaic.version = 11 : i64} {
  func.func @_cat_vmem_kernel(%arg0: i32, %arg1: memref<2x3x256xbf16, #tpu.memory_space<vmem>>, %arg2: memref<2x5x256xbf16, #tpu.memory_space<vmem>>, %arg3: memref<2x8x256xbf16, #tpu.memory_space<vmem>>) attributes {dimension_semantics = [#tpu.dimension_semantics<parallel>], iteration_bounds = array<i64: 1>, scalar_prefetch = 0 : i64, scratch_operands = 0 : i64, tpu.core_type = #tpu.core_type<tc>, window_params = [{transform_indices = @transform_0, window_bounds = array<i64: 2, 3, 256>}, {transform_indices = @transform_1, window_bounds = array<i64: 2, 5, 256>}, {transform_indices = @transform_2, window_bounds = array<i64: 2, 8, 256>}]} {
    %c0 = arith.constant 0 : index
    %c0_0 = arith.constant 0 : index
    %c0_1 = arith.constant 0 : index
    %0 = vector.load %arg1[%c0, %c0_0, %c0_1] : memref<2x3x256xbf16, #tpu.memory_space<vmem>>, vector<2x3x256xbf16>
    %c0_2 = arith.constant 0 : index
    %c0_3 = arith.constant 0 : index
    %c0_4 = arith.constant 0 : index
    %1 = vector.load %arg3[%c0_2, %c0_3, %c0_4] : memref<2x8x256xbf16, #tpu.memory_space<vmem>>, vector<2x3x256xbf16>
    tpu.vector_store %arg3[%c0_2, %c0_3, %c0_4], %0 {strides = array<i32>} : memref<2x8x256xbf16, #tpu.memory_space<vmem>>, vector<2x3x256xbf16>,
    %c0_5 = arith.constant 0 : index
    %c0_6 = arith.constant 0 : index
    %c0_7 = arith.constant 0 : index
    %2 = vector.load %arg2[%c0_5, %c0_6, %c0_7] : memref<2x5x256xbf16, #tpu.memory_space<vmem>>, vector<2x5x256xbf16>
    %c0_8 = arith.constant 0 : index
    %c3 = arith.constant 3 : index
    %c0_9 = arith.constant 0 : index
    %3 = vector.load %arg3[%c0_8, %c3, %c0_9] : memref<2x8x256xbf16, #tpu.memory_space<vmem>>, vector<2x5x256xbf16>
    tpu.vector_store %arg3[%c0_8, %c3, %c0_9], %2 {strides = array<i32>} : memref<2x8x256xbf16, #tpu.memory_space<vmem>>, vector<2x5x256xbf16>,
    return
  }
  func.func @transform_0(%arg0: i32) -> (i32, i32, i32) {
    %c0_i32 = arith.constant 0 : i32
    %c0_i32_0 = arith.constant 0 : i32
    %c0_i32_1 = arith.constant 0 : i32
    return %arg0, %c0_i32, %c0_i32_0 : i32, i32, i32
  }
  func.func @transform_1(%arg0: i32) -> (i32, i32, i32) {
    %c0_i32 = arith.constant 0 : i32
    %c0_i32_0 = arith.constant 0 : i32
    %c0_i32_1 = arith.constant 0 : i32
    return %arg0, %c0_i32, %c0_i32_0 : i32, i32, i32
  }
  func.func @transform_2(%arg0: i32) -> (i32, i32, i32) {
    %c0_i32 = arith.constant 0 : i32
    %c0_i32_0 = arith.constant 0 : i32
    %c0_i32_1 = arith.constant 0 : i32
    return %arg0, %c0_i32, %c0_i32_0 : i32, i32, i32
  }
}

module attributes {stable_mosaic.version = 11 : i64} {
  func.func @_cat_vmem_kernel(%arg0: i32, %arg1: memref<2x4x256xf32, #tpu.memory_space<vmem>>, %arg2: memref<2x6x256xf32, #tpu.memory_space<vmem>>, %arg3: memref<2x2x256xf32, #tpu.memory_space<vmem>>, %arg4: memref<2x12x256xf32, #tpu.memory_space<vmem>>) attributes {dimension_semantics = [#tpu.dimension_semantics<parallel>], iteration_bounds = array<i64: 1>, scalar_prefetch = 0 : i64, scratch_operands = 0 : i64, tpu.core_type = #tpu.core_type<tc>, window_params = [{transform_indices = @transform_0, window_bounds = array<i64: 2, 4, 256>}, {transform_indices = @transform_1, window_bounds = array<i64: 2, 6, 256>}, {transform_indices = @transform_2, window_bounds = array<i64: 2, 2, 256>}, {transform_indices = @transform_3, window_bounds = array<i64: 2, 12, 256>}]} {
    %c0 = arith.constant 0 : index
    %c0_0 = arith.constant 0 : index
    %c0_1 = arith.constant 0 : index
    %0 = vector.load %arg1[%c0, %c0_0, %c0_1] : memref<2x4x256xf32, #tpu.memory_space<vmem>>, vector<2x4x256xf32>
    %c0_2 = arith.constant 0 : index
    %c0_3 = arith.constant 0 : index
    %c0_4 = arith.constant 0 : index
    %1 = vector.load %arg4[%c0_2, %c0_3, %c0_4] : memref<2x12x256xf32, #tpu.memory_space<vmem>>, vector<2x4x256xf32>
    tpu.vector_store %arg4[%c0_2, %c0_3, %c0_4], %0 {strides = array<i32>} : memref<2x12x256xf32, #tpu.memory_space<vmem>>, vector<2x4x256xf32>,
    %c0_5 = arith.constant 0 : index
    %c0_6 = arith.constant 0 : index
    %c0_7 = arith.constant 0 : index
    %2 = vector.load %arg2[%c0_5, %c0_6, %c0_7] : memref<2x6x256xf32, #tpu.memory_space<vmem>>, vector<2x6x256xf32>
    %c0_8 = arith.constant 0 : index
    %c4 = arith.constant 4 : index
    %c0_9 = arith.constant 0 : index
    %3 = vector.load %arg4[%c0_8, %c4, %c0_9] : memref<2x12x256xf32, #tpu.memory_space<vmem>>, vector<2x6x256xf32>
    tpu.vector_store %arg4[%c0_8, %c4, %c0_9], %2 {strides = array<i32>} : memref<2x12x256xf32, #tpu.memory_space<vmem>>, vector<2x6x256xf32>,
    %c0_10 = arith.constant 0 : index
    %c0_11 = arith.constant 0 : index
    %c0_12 = arith.constant 0 : index
    %4 = vector.load %arg3[%c0_10, %c0_11, %c0_12] : memref<2x2x256xf32, #tpu.memory_space<vmem>>, vector<2x2x256xf32>
    %c0_13 = arith.constant 0 : index
    %c10 = arith.constant 10 : index
    %c0_14 = arith.constant 0 : index
    %5 = vector.load %arg4[%c0_13, %c10, %c0_14] : memref<2x12x256xf32, #tpu.memory_space<vmem>>, vector<2x2x256xf32>
    tpu.vector_store %arg4[%c0_13, %c10, %c0_14], %4 {strides = array<i32>} : memref<2x12x256xf32, #tpu.memory_space<vmem>>, vector<2x2x256xf32>,
    return
  }
  func.func @transform_0(%arg0: i32) -> (i32, i32, i32) {
    %c0_i32 = arith.constant 0 : i32
    %c0_i32_0 = arith.constant 0 : i32
    %c0_i32_1 = arith.constant 0 : i32
    return %arg0, %c0_i32, %c0_i32_0 : i32, i32, i32
  }
  func.func @transform_1(%arg0: i32) -> (i32, i32, i32) {
    %c0_i32 = arith.constant 0 : i32
    %c0_i32_0 = arith.constant 0 : i32
    %c0_i32_1 = arith.constant 0 : i32
    return %arg0, %c0_i32, %c0_i32_0 : i32, i32, i32
  }
  func.func @transform_2(%arg0: i32) -> (i32, i32, i32) {
    %c0_i32 = arith.constant 0 : i32
    %c0_i32_0 = arith.constant 0 : i32
    %c0_i32_1 = arith.constant 0 : i32
    return %arg0, %c0_i32, %c0_i32_0 : i32, i32, i32
  }
  func.func @transform_3(%arg0: i32) -> (i32, i32, i32) {
    %c0_i32 = arith.constant 0 : i32
    %c0_i32_0 = arith.constant 0 : i32
    %c0_i32_1 = arith.constant 0 : i32
    return %arg0, %c0_i32, %c0_i32_0 : i32, i32, i32
  }
}

</mosaic_0001>

<bundles_post_ra>
// kernel: tpu_custom_call.1
= control target key start
LH: loop header
LB: loop body
LE: loop exit
PB: predicated region body
PF: predicated region fallthrough
CT: control target
= control target key end

     0   :  { %v58_v0 = vlaneseq  ;;  %v91_v4 = vmov 1983009808   ;;  %s172_s0 = inlined_call_operand.vmem [shape: f32[2,4,256], index: 0, kind: input, shape index: {}]   ;;  %s173_s3 = inlined_call_operand.vmem [shape: f32[2,12,256], index: 3, kind: output, shape index: {}]   ;;  %s174_s1 = inlined_call_operand.vmem [shape: f32[2,6,256], index: 1, kind: input, shape index: {}]   ;;  %s175_s2 = inlined_call_operand.vmem [shape: f32[2,2,256], index: 2, kind: input, shape index: {}]  }
   0x1   :  { %v14_v1 = vld [vmem:[%s172_s0] sm:$0xff]  ;;  %v15_v2 = vld [vmem:[%s172_s0 + $0x8] sm:$0xff]  ;;  %v56_v5 = vunpack.c.l.s4 %v91_v4  ;;  %v28_v10 = vld [vmem:[%s174_s1 + $0x10] sm:$0x3f] }
   0x2   :  { %v26_v3 = vld [vmem:[%s174_s1] sm:$0x3f]  ;;  %22 = vst [vmem:[%s173_s3] sm:$0xf] %v14_v1  ;;  %v18_v6 = vcombine.high %v14_v1, %v14_v1  ;;  %24 = vst [vmem:[%s173_s3 + $0x20] sm:$0xf] %v15_v2  ;;  %v19_v7 = vcombine.high %v15_v2, %v15_v2  ;;  %v59_v11 = vshrl.u32 %v58_v0, 7 }
   0x3   :  { %v34_v8 = vrot.slane %v26_v3, 4  ;;  %v27_v9 = vld [vmem:[%s174_s1 + $0x8] sm:$0x3f]  ;;  %v36_v13 = vrot.slane %v28_v10, 4  ;;  %v29_v14 = vld [vmem:[%s174_s1 + $0x18] sm:$0x3f]  ;;  %v57_v15 = vunpack.c.0.s8 %v56_v5 }
   0x4   :  { %v35_v12 = vrot.slane %v27_v9, 4  ;;  %23 = vst [vmem:[%s173_s3 + $0x8] sm:$0xf] %v18_v6  ;;  %25 = vst [vmem:[%s173_s3 + $0x28] sm:$0xf] %v19_v7  ;;  %v37_v16 = vrot.slane %v29_v14, 4 }
   0x5   :  { %42 = vst [vmem:[%s173_s3 + $0x10] ss:$-12 sps:$4 sm:$0xf3] %v34_v8   ;;  %v89_v17 = vld [vmem:[%s175_s2] ss:$0 sps:$4 sm:$0xff]   ;;  %v60_v18 = vsub.s32 %v57_v15, %v59_v11 }
   0x6   :  { %43 = vst [vmem:[%s173_s3 + $0x18] ss:$-12 sps:$4 sm:$0xf3] %v35_v12   ;;  %46 = vst [vmem:[%s173_s3 + $0x30] ss:$-12 sps:$4 sm:$0xf3] %v36_v13  }
   0x7   :  { %v90_v19 = vld [vmem:[%s175_s2 + $0x4] ss:$0 sps:$4 sm:$0xff]   ;;  %47 = vst [vmem:[%s173_s3 + $0x38] ss:$-12 sps:$4 sm:$0xf3] %v37_v16   ;;  %v61_v20 = vrot.slane %v89_v17, %v60_v18 }
   0x8   :  { %84 = vst.sshfl [vmem:[%s173_s3 + $0x10] sm:$0x30 pattern:$0x76325410] %v89_v17  ;;  %v70_v21 = vrot.slane %v90_v19, %v60_v18 }
   0x9   :  { %85 = vst.sshfl [vmem:[%s173_s3 + $0x30] sm:$0x30 pattern:$0x76325410] %v90_v19  ;;  %v62_v22 = vcombine.high %v61_v20, %v61_v20 }
   0xa   :  { %v71_v23 = vcombine.high %v70_v21, %v70_v21 }
   0xb   :  { %77 = vst [vmem:[%s173_s3 + $0x18] sm:$0xc] %v62_v22 }
   0xc   :  { %79 = vst [vmem:[%s173_s3 + $0x38] sm:$0xc] %v71_v23 }

// kernel: tpu_custom_call.1
= control target key start
LH: loop header
LB: loop body
LE: loop exit
PB: predicated region body
PF: predicated region fallthrough
CT: control target
= control target key end

     0   :  { %7 = vsyncpa [#allocation3], 0  ;;  %s551_s0 = inlined_call_operand.hbm [shape: f32[8,16,1024], index: 0, kind: input, shape index: {}]   ;;  %s552_s1 = inlined_call_operand.hbm [shape: f32[8,8,1024], index: 1, kind: input, shape index: {}]   ;;  %s553_s2 = inlined_call_operand.hbm [shape: f32[8,24,1024], index: 2, kind: output, shape index: {}]  }
   0x1   :  { %8 = vsyncpa [#allocation6], 0 }
   0x2   :  { %9 = vsyncpa [#allocation4], 0  ;;  %s513_s9 = smov [#allocation2]  }
   0x3   :  { %s15_s10 = sshll.u32 %s513_s9, 4  ;;  %s16_s10 = int_to_ptr.vmem [resolvable:$true] %s15_s10 }
   0x4   :  { %s455_s11 = scalar_lea.vmem %s16_s10, 16384  ;;  %p460_p1 = scmp.lt.s32.totalorder %s16_s10, %s16_s10 }
   0x5   :  { %p456_p0 = scmp.ne.s32.totalorder %s16_s10, %s455_s11  ;;  %p461_p2 = scmp.lt.s32.totalorder %s455_s11, %s455_s11 }
   0x7   :  { %p462_p3 = por %p461_p2, %p460_p1 }
   0x9   :  { %p463_p4 = pnand %p462_p3, %p456_p0 }
   0xb   :  { %466 = shalt.err (!%p463_p4)
}
   0xc   :  { %s514_s12 = smov 1024   ;;  %s515_s13 = smov 64  }
   0xd   :  { %21 = dma.hbm_to_vmem [thread:$0]  %s551_s0, 16384, %s16_s10, [#allocation3], %s514_s12, %s514_s12, %s515_s13  }
   0xe   :  { %s516_s16 = smov [#allocation5]  }
   0xf   :  { %s27_s17 = sshll.u32 %s516_s16, 4  ;;  %s28_s17 = int_to_ptr.vmem [resolvable:$true] %s27_s17 }
  0x10   :  { %s475_s18 = scalar_lea.vmem %s28_s17, 8192  ;;  %p480_p6 = scmp.lt.s32.totalorder %s28_s17, %s28_s17 }
  0x11   :  { %p476_p5 = scmp.ne.s32.totalorder %s28_s17, %s475_s18  ;;  %p481_p7 = scmp.lt.s32.totalorder %s475_s18, %s475_s18 }
  0x13   :  { %p482_p8 = por %p481_p7, %p480_p6 }
  0x15   :  { %p483_p9 = pnand %p482_p8, %p476_p5 }
  0x17   :  { %486 = shalt.err (!%p483_p9)
}
  0x18   :  { %33 = dma.hbm_to_vmem [thread:$0]  %s552_s1, 8192, %s28_s17, [#allocation6], %s514_s12, %s514_s12, %s515_s13  }
  0x19   :  { %507 = dma.done.wait [#allocation3], 16384  }
  0x1a   :  { %508 = vsyncadd [#allocation3], 4294950912 }
  0x1b   :  { %509 = dma.done.wait [#allocation6], 8192  }
  0x1c   :  { %510 = vsyncadd [#allocation6], 4294959104  ;;  %v40_v0 = vld [vmem:[#allocation2] sm:$0xff]  ;;  %v41_v1 = vld [vmem:[#allocation2 + $0x8] sm:$0xff]  ;;  %s517_s0 = smov [#allocation7]  }
  0x1d   :  { %v42_v2 = vld [vmem:[#allocation2 + $0x10] sm:$0xff]  ;;  %168 = vst [vmem:[#allocation7] sm:$0xff] %v40_v0  ;;  %169 = vst [vmem:[#allocation7 + $0x8] sm:$0xff] %v41_v1  ;;  %v43_v3 = vld [vmem:[#allocation2 + $0x18] sm:$0xff]  ;;  %s429_s1 = sshll.u32 %s517_s0, 4  ;;  %s430_s1 = int_to_ptr.vmem [resolvable:$true] %s429_s1 }
  0x1e   :  { %170 = vst [vmem:[#allocation7 + $0x10] sm:$0xff] %v42_v2  ;;  %v44_v4 = vld [vmem:[#allocation2 + $0x20] sm:$0xff]  ;;  %v45_v5 = vld [vmem:[#allocation2 + $0x28] sm:$0xff]  ;;  %171 = vst [vmem:[#allocation7 + $0x18] sm:$0xff] %v43_v3  ;;  %s487_s21 = scalar_lea.vmem %s430_s1, 24576  ;;  %p492_p11 = scmp.lt.s32.totalorder %s430_s1, %s430_s1 }
  0x1f   :  { %172 = vst [vmem:[#allocation7 + $0x20] sm:$0xff] %v44_v4  ;;  %173 = vst [vmem:[#allocation7 + $0x28] sm:$0xff] %v45_v5  ;;  %v46_v6 = vld [vmem:[#allocation2 + $0x30] sm:$0xff]  ;;  %v47_v7 = vld [vmem:[#allocation2 + $0x38] sm:$0xff]  ;;  %p488_p10 = scmp.ne.s32.totalorder %s430_s1, %s487_s21  ;;  %p493_p12 = scmp.lt.s32.totalorder %s487_s21, %s487_s21 }
  0x20   :  { %v48_v8 = vld [vmem:[#allocation2 + $0x40] sm:$0xff]  ;;  %174 = vst [vmem:[#allocation7 + $0x30] sm:$0xff] %v46_v6  ;;  %175 = vst [vmem:[#allocation7 + $0x38] sm:$0xff] %v47_v7  ;;  %v49_v9 = vld [vmem:[#allocation2 + $0x48] sm:$0xff] }
  0x21   :  { %176 = vst [vmem:[#allocation7 + $0x40] sm:$0xff] %v48_v8  ;;  %v50_v10 = vld [vmem:[#allocation2 + $0x50] sm:$0xff]  ;;  %v51_v11 = vld [vmem:[#allocation2 + $0x58] sm:$0xff]  ;;  %177 = vst [vmem:[#allocation7 + $0x48] sm:$0xff] %v49_v9  ;;  %p494_p13 = por %p493_p12, %p492_p11 }
  0x22   :  { %178 = vst [vmem:[#allocation7 + $0x50] sm:$0xff] %v50_v10  ;;  %179 = vst [vmem:[#allocation7 + $0x58] sm:$0xff] %v51_v11  ;;  %v52_v12 = vld [vmem:[#allocation2 + $0x60] sm:$0xff]  ;;  %v53_v13 = vld [vmem:[#allocation2 + $0x68] sm:$0xff] }
  0x23   :  { %v54_v14 = vld [vmem:[#allocation2 + $0x70] sm:$0xff]  ;;  %180 = vst [vmem:[#allocation7 + $0x60] sm:$0xff] %v52_v12  ;;  %181 = vst [vmem:[#allocation7 + $0x68] sm:$0xff] %v53_v13  ;;  %v55_v15 = vld [vmem:[#allocation2 + $0x78] sm:$0xff]  ;;  %p495_p0 = pnand %p494_p13, %p488_p10 }
  0x24   :  { %182 = vst [vmem:[#allocation7 + $0x70] sm:$0xff] %v54_v14  ;;  %v56_v16 = vld [vmem:[#allocation2 + $0x80] sm:$0xff]  ;;  %v57_v17 = vld [vmem:[#allocation2 + $0x88] sm:$0xff]  ;;  %183 = vst [vmem:[#allocation7 + $0x78] sm:$0xff] %v55_v15 }
  0x25   :  { %184 = vst [vmem:[#allocation7 + $0xc0] sm:$0xff] %v56_v16  ;;  %185 = vst [vmem:[#allocation7 + $0xc8] sm:$0xff] %v57_v17  ;;  %v58_v18 = vld [vmem:[#allocation2 + $0x90] sm:$0xff]  ;;  %v59_v19 = vld [vmem:[#allocation2 + $0x98] sm:$0xff] }
  0x26   :  { %v60_v20 = vld [vmem:[#allocation2 + $0xa0] sm:$0xff]  ;;  %186 = vst [vmem:[#allocation7 + $0xd0] sm:$0xff] %v58_v18  ;;  %187 = vst [vmem:[#allocation7 + $0xd8] sm:$0xff] %v59_v19  ;;  %v61_v21 = vld [vmem:[#allocation2 + $0xa8] sm:$0xff] }
  0x27   :  { %188 = vst [vmem:[#allocation7 + $0xe0] sm:$0xff] %v60_v20  ;;  %v62_v22 = vld [vmem:[#allocation2 + $0xb0] sm:$0xff]  ;;  %v63_v23 = vld [vmem:[#allocation2 + $0xb8] sm:$0xff]  ;;  %189 = vst [vmem:[#allocation7 + $0xe8] sm:$0xff] %v61_v21 }
  0x28   :  { %190 = vst [vmem:[#allocation7 + $0xf0] sm:$0xff] %v62_v22  ;;  %191 = vst [vmem:[#allocation7 + $0xf8] sm:$0xff] %v63_v23  ;;  %v64_v24 = vld [vmem:[#allocation2 + $0xc0] sm:$0xff]  ;;  %v65_v25 = vld [vmem:[#allocation2 + $0xc8] sm:$0xff] }
  0x29   :  { %v66_v26 = vld [vmem:[#allocation2 + $0xd0] sm:$0xff]  ;;  %192 = vst [vmem:[#allocation7 + $0x100] sm:$0xff] %v64_v24  ;;  %193 = vst [vmem:[#allocation7 + $0x108] sm:$0xff] %v65_v25  ;;  %v67_v27 = vld [vmem:[#allocation2 + $0xd8] sm:$0xff] }
  0x2a   :  { %194 = vst [vmem:[#allocation7 + $0x110] sm:$0xff] %v66_v26  ;;  %v68_v28 = vld [vmem:[#allocation2 + $0xe0] sm:$0xff]  ;;  %v69_v29 = vld [vmem:[#allocation2 + $0xe8] sm:$0xff]  ;;  %195 = vst [vmem:[#allocation7 + $0x118] sm:$0xff] %v67_v27 }
  0x2b   :  { %196 = vst [vmem:[#allocation7 + $0x120] sm:$0xff] %v68_v28  ;;  %197 = vst [vmem:[#allocation7 + $0x128] sm:$0xff] %v69_v29  ;;  %v70_v30 = vld [vmem:[#allocation2 + $0xf0] sm:$0xff]  ;;  %v71_v31 = vld [vmem:[#allocation2 + $0xf8] sm:$0xff] }
  0x2c   :  { %v72_v32 = vld [vmem:[#allocation2 + $0x100] sm:$0xff]  ;;  %198 = vst [vmem:[#allocation7 + $0x130] sm:$0xff] %v70_v30  ;;  %199 = vst [vmem:[#allocation7 + $0x138] sm:$0xff] %v71_v31  ;;  %v73_v33 = vld [vmem:[#allocation2 + $0x108] sm:$0xff] }
  0x2d   :  { %200 = vst [vmem:[#allocation7 + $0x180] sm:$0xff] %v72_v32  ;;  %v74_v34 = vld [vmem:[#allocation2 + $0x110] sm:$0xff]  ;;  %v75_v35 = vld [vmem:[#allocation2 + $0x118] sm:$0xff]  ;;  %201 = vst [vmem:[#allocation7 + $0x188] sm:$0xff] %v73_v33 }
  0x2e   :  { %202 = vst [vmem:[#allocation7 + $0x190] sm:$0xff] %v74_v34  ;;  %203 = vst [vmem:[#allocation7 + $0x198] sm:$0xff] %v75_v35  ;;  %v76_v36 = vld [vmem:[#allocation2 + $0x120] sm:$0xff]  ;;  %v77_v37 = vld [vmem:[#allocation2 + $0x128] sm:$0xff] }
  0x2f   :  { %v78_v38 = vld [vmem:[#allocation2 + $0x130] sm:$0xff]  ;;  %204 = vst [vmem:[#allocation7 + $0x1a0] sm:$0xff] %v76_v36  ;;  %205 = vst [vmem:[#allocation7 + $0x1a8] sm:$0xff] %v77_v37  ;;  %v79_v39 = vld [vmem:[#allocation2 + $0x138] sm:$0xff] }
  0x30   :  { %206 = vst [vmem:[#allocation7 + $0x1b0] sm:$0xff] %v78_v38  ;;  %v80_v40 = vld [vmem:[#allocation2 + $0x140] sm:$0xff]  ;;  %v81_v41 = vld [vmem:[#allocation2 + $0x148] sm:$0xff]  ;;  %207 = vst [vmem:[#allocation7 + $0x1b8] sm:$0xff] %v79_v39 }
  0x31   :  { %208 = vst [vmem:[#allocation7 + $0x1c0] sm:$0xff] %v80_v40  ;;  %209 = vst [vmem:[#allocation7 + $0x1c8] sm:$0xff] %v81_v41  ;;  %v82_v42 = vld [vmem:[#allocation2 + $0x150] sm:$0xff]  ;;  %v83_v43 = vld [vmem:[#allocation2 + $0x158] sm:$0xff] }
  0x32   :  { %v84_v44 = vld [vmem:[#allocation2 + $0x160] sm:$0xff]  ;;  %210 = vst [vmem:[#allocation7 + $0x1d0] sm:$0xff] %v82_v42  ;;  %211 = vst [vmem:[#allocation7 + $0x1d8] sm:$0xff] %v83_v43  ;;  %v85_v45 = vld [vmem:[#allocation2 + $0x168] sm:$0xff] }
  0x33   :  { %212 = vst [vmem:[#allocation7 + $0x1e0] sm:$0xff] %v84_v44  ;;  %v86_v46 = vld [vmem:[#allocation2 + $0x170] sm:$0xff]  ;;  %v87_v47 = vld [vmem:[#allocation2 + $0x178] sm:$0xff]  ;;  %213 = vst [vmem:[#allocation7 + $0x1e8] sm:$0xff] %v85_v45 }
  0x34   :  { %214 = vst [vmem:[#allocation7 + $0x1f0] sm:$0xff] %v86_v46  ;;  %215 = vst [vmem:[#allocation7 + $0x1f8] sm:$0xff] %v87_v47  ;;  %v88_v48 = vld [vmem:[#allocation2 + $0x180] sm:$0xff]  ;;  %v89_v49 = vld [vmem:[#allocation2 + $0x188] sm:$0xff] }
  0x35   :  { %v90_v50 = vld [vmem:[#allocation2 + $0x190] sm:$0xff]  ;;  %216 = vst [vmem:[#allocation7 + $0x240] sm:$0xff] %v88_v48  ;;  %217 = vst [vmem:[#allocation7 + $0x248] sm:$0xff] %v89_v49  ;;  %v91_v51 = vld [vmem:[#allocation2 + $0x198] sm:$0xff] }
  0x36   :  { %218 = vst [vmem:[#allocation7 + $0x250] sm:$0xff] %v90_v50  ;;  %v92_v52 = vld [vmem:[#allocation2 + $0x1a0] sm:$0xff]  ;;  %v93_v53 = vld [vmem:[#allocation2 + $0x1a8] sm:$0xff]  ;;  %219 = vst [vmem:[#allocation7 + $0x258] sm:$0xff] %v91_v51 }
  0x37   :  { %220 = vst [vmem:[#allocation7 + $0x260] sm:$0xff] %v92_v52  ;;  %221 = vst [vmem:[#allocation7 + $0x268] sm:$0xff] %v93_v53  ;;  %v94_v54 = vld [vmem:[#allocation2 + $0x1b0] sm:$0xff]  ;;  %v95_v55 = vld [vmem:[#allocation2 + $0x1b8] sm:$0xff] }
  0x38   :  { %v96_v56 = vld [vmem:[#allocation2 + $0x1c0] sm:$0xff]  ;;  %222 = vst [vmem:[#allocation7 + $0x270] sm:$0xff] %v94_v54  ;;  %223 = vst [vmem:[#allocation7 + $0x278] sm:$0xff] %v95_v55  ;;  %v97_v57 = vld [vmem:[#allocation2 + $0x1c8] sm:$0xff] }
  0x39   :  { %224 = vst [vmem:[#allocation7 + $0x280] sm:$0xff] %v96_v56  ;;  %v98_v58 = vld [vmem:[#allocation2 + $0x1d0] sm:$0xff]  ;;  %v99_v59 = vld [vmem:[#allocation2 + $0x1d8] sm:$0xff]  ;;  %225 = vst [vmem:[#allocation7 + $0x288] sm:$0xff] %v97_v57 }
  0x3a   :  { %226 = vst [vmem:[#allocation7 + $0x290] sm:$0xff] %v98_v58  ;;  %227 = vst [vmem:[#allocation7 + $0x298] sm:$0xff] %v99_v59  ;;  %v100_v60 = vld [vmem:[#allocation2 + $0x1e0] sm:$0xff]  ;;  %v101_v61 = vld [vmem:[#allocation2 + $0x1e8] sm:$0xff] }
  0x3b   :  { %v102_v62 = vld [vmem:[#allocation2 + $0x1f0] sm:$0xff]  ;;  %228 = vst [vmem:[#allocation7 + $0x2a0] sm:$0xff] %v100_v60  ;;  %229 = vst [vmem:[#allocation7 + $0x2a8] sm:$0xff] %v101_v61  ;;  %v103_v63 = vld [vmem:[#allocation2 + $0x1f8] sm:$0xff] }
  0x3c   :  { %230 = vst [vmem:[#allocation7 + $0x2b0] sm:$0xff] %v102_v62  ;;  %v104_v0 = vld [vmem:[#allocation2 + $0x200] sm:$0xff]  ;;  %v105_v1 = vld [vmem:[#allocation2 + $0x208] sm:$0xff]  ;;  %231 = vst [vmem:[#allocation7 + $0x2b8] sm:$0xff] %v103_v63 }
  0x3d   :  { %232 = vst [vmem:[#allocation7 + $0x300] sm:$0xff] %v104_v0  ;;  %233 = vst [vmem:[#allocation7 + $0x308] sm:$0xff] %v105_v1  ;;  %v106_v2 = vld [vmem:[#allocation2 + $0x210] sm:$0xff]  ;;  %v107_v3 = vld [vmem:[#allocation2 + $0x218] sm:$0xff] }
  0x3e   :  { %v108_v4 = vld [vmem:[#allocation2 + $0x220] sm:$0xff]  ;;  %234 = vst [vmem:[#allocation7 + $0x310] sm:$0xff] %v106_v2  ;;  %235 = vst [vmem:[#allocation7 + $0x318] sm:$0xff] %v107_v3  ;;  %v109_v5 = vld [vmem:[#allocation2 + $0x228] sm:$0xff] }
  0x3f   :  { %236 = vst [vmem:[#allocation7 + $0x320] sm:$0xff] %v108_v4  ;;  %v110_v6 = vld [vmem:[#allocation2 + $0x230] sm:$0xff]  ;;  %v111_v7 = vld [vmem:[#allocation2 + $0x238] sm:$0xff]  ;;  %237 = vst [vmem:[#allocation7 + $0x328] sm:$0xff] %v109_v5 }
  0x40   :  { %238 = vst [vmem:[#allocation7 + $0x330] sm:$0xff] %v110_v6  ;;  %239 = vst [vmem:[#allocation7 + $0x338] sm:$0xff] %v111_v7  ;;  %v112_v8 = vld [vmem:[#allocation2 + $0x240] sm:$0xff]  ;;  %v113_v9 = vld [vmem:[#allocation2 + $0x248] sm:$0xff] }
  0x41   :  { %v114_v10 = vld [vmem:[#allocation2 + $0x250] sm:$0xff]  ;;  %240 = vst [vmem:[#allocation7 + $0x340] sm:$0xff] %v112_v8  ;;  %241 = vst [vmem:[#allocation7 + $0x348] sm:$0xff] %v113_v9  ;;  %v115_v11 = vld [vmem:[#allocation2 + $0x258] sm:$0xff] }
  0x42   :  { %242 = vst [vmem:[#allocation7 + $0x350] sm:$0xff] %v114_v10  ;;  %v116_v12 = vld [vmem:[#allocation2 + $0x260] sm:$0xff]  ;;  %v117_v13 = vld [vmem:[#allocation2 + $0x268] sm:$0xff]  ;;  %243 = vst [vmem:[#allocation7 + $0x358] sm:$0xff] %v115_v11 }
  0x43   :  { %244 = vst [vmem:[#allocation7 + $0x360] sm:$0xff] %v116_v12  ;;  %245 = vst [vmem:[#allocation7 + $0x368] sm:$0xff] %v117_v13  ;;  %v118_v14 = vld [vmem:[#allocation2 + $0x270] sm:$0xff]  ;;  %v119_v15 = vld [vmem:[#allocation2 + $0x278] sm:$0xff] }
  0x44   :  { %v120_v16 = vld [vmem:[#allocation2 + $0x280] sm:$0xff]  ;;  %246 = vst [vmem:[#allocation7 + $0x370] sm:$0xff] %v118_v14  ;;  %247 = vst [vmem:[#allocation7 + $0x378] sm:$0xff] %v119_v15  ;;  %v121_v17 = vld [vmem:[#allocation2 + $0x288] sm:$0xff] }
  0x45   :  { %248 = vst [vmem:[#allocation7 + $0x3c0] sm:$0xff] %v120_v16  ;;  %v122_v18 = vld [vmem:[#allocation2 + $0x290] sm:$0xff]  ;;  %v123_v19 = vld [vmem:[#allocation2 + $0x298] sm:$0xff]  ;;  %249 = vst [vmem:[#allocation7 + $0x3c8] sm:$0xff] %v121_v17 }
  0x46   :  { %250 = vst [vmem:[#allocation7 + $0x3d0] sm:$0xff] %v122_v18  ;;  %251 = vst [vmem:[#allocation7 + $0x3d8] sm:$0xff] %v123_v19  ;;  %v124_v20 = vld [vmem:[#allocation2 + $0x2a0] sm:$0xff]  ;;  %v125_v21 = vld [vmem:[#allocation2 + $0x2a8] sm:$0xff] }
  0x47   :  { %v126_v22 = vld [vmem:[#allocation2 + $0x2b0] sm:$0xff]  ;;  %252 = vst [vmem:[#allocation7 + $0x3e0] sm:$0xff] %v124_v20  ;;  %253 = vst [vmem:[#allocation7 + $0x3e8] sm:$0xff] %v125_v21  ;;  %v127_v23 = vld [vmem:[#allocation2 + $0x2b8] sm:$0xff] }
  0x48   :  { %254 = vst [vmem:[#allocation7 + $0x3f0] sm:$0xff] %v126_v22  ;;  %v128_v24 = vld [vmem:[#allocation2 + $0x2c0] sm:$0xff]  ;;  %v129_v25 = vld [vmem:[#allocation2 + $0x2c8] sm:$0xff]  ;;  %255 = vst [vmem:[#allocation7 + $0x3f8] sm:$0xff] %v127_v23 }
  0x49   :  { %256 = vst [vmem:[#allocation7 + $0x400] sm:$0xff] %v128_v24  ;;  %257 = vst [vmem:[#allocation7 + $0x408] sm:$0xff] %v129_v25  ;;  %v130_v26 = vld [vmem:[#allocation2 + $0x2d0] sm:$0xff]  ;;  %v131_v27 = vld [vmem:[#allocation2 + $0x2d8] sm:$0xff] }
  0x4a   :  { %v132_v28 = vld [vmem:[#allocation2 + $0x2e0] sm:$0xff]  ;;  %258 = vst [vmem:[#allocation7 + $0x410] sm:$0xff] %v130_v26  ;;  %259 = vst [vmem:[#allocation7 + $0x418] sm:$0xff] %v131_v27  ;;  %v133_v29 = vld [vmem:[#allocation2 + $0x2e8] sm:$0xff] }
  0x4b   :  { %260 = vst [vmem:[#allocation7 + $0x420] sm:$0xff] %v132_v28  ;;  %v134_v30 = vld [vmem:[#allocation2 + $0x2f0] sm:$0xff]  ;;  %v135_v31 = vld [vmem:[#allocation2 + $0x2f8] sm:$0xff]  ;;  %261 = vst [vmem:[#allocation7 + $0x428] sm:$0xff] %v133_v29 }
  0x4c   :  { %262 = vst [vmem:[#allocation7 + $0x430] sm:$0xff] %v134_v30  ;;  %263 = vst [vmem:[#allocation7 + $0x438] sm:$0xff] %v135_v31  ;;  %v136_v32 = vld [vmem:[#allocation2 + $0x300] sm:$0xff]  ;;  %v137_v33 = vld [vmem:[#allocation2 + $0x308] sm:$0xff] }
  0x4d   :  { %v138_v34 = vld [vmem:[#allocation2 + $0x310] sm:$0xff]  ;;  %264 = vst [vmem:[#allocation7 + $0x480] sm:$0xff] %v136_v32  ;;  %265 = vst [vmem:[#allocation7 + $0x488] sm:$0xff] %v137_v33  ;;  %v139_v35 = vld [vmem:[#allocation2 + $0x318] sm:$0xff] }
  0x4e   :  { %266 = vst [vmem:[#allocation7 + $0x490] sm:$0xff] %v138_v34  ;;  %v140_v36 = vld [vmem:[#allocation2 + $0x320] sm:$0xff]  ;;  %v141_v37 = vld [vmem:[#allocation2 + $0x328] sm:$0xff]  ;;  %267 = vst [vmem:[#allocation7 + $0x498] sm:$0xff] %v139_v35 }
  0x4f   :  { %268 = vst [vmem:[#allocation7 + $0x4a0] sm:$0xff] %v140_v36  ;;  %269 = vst [vmem:[#allocation7 + $0x4a8] sm:$0xff] %v141_v37  ;;  %v142_v38 = vld [vmem:[#allocation2 + $0x330] sm:$0xff]  ;;  %v143_v39 = vld [vmem:[#allocation2 + $0x338] sm:$0xff] }
  0x50   :  { %v144_v40 = vld [vmem:[#allocation2 + $0x340] sm:$0xff]  ;;  %270 = vst [vmem:[#allocation7 + $0x4b0] sm:$0xff] %v142_v38  ;;  %271 = vst [vmem:[#allocation7 + $0x4b8] sm:$0xff] %v143_v39  ;;  %v145_v41 = vld [vmem:[#allocation2 + $0x348] sm:$0xff] }
  0x51   :  { %272 = vst [vmem:[#allocation7 + $0x4c0] sm:$0xff] %v144_v40  ;;  %v146_v42 = vld [vmem:[#allocation2 + $0x350] sm:$0xff]  ;;  %v147_v43 = vld [vmem:[#allocation2 + $0x358] sm:$0xff]  ;;  %273 = vst [vmem:[#allocation7 + $0x4c8] sm:$0xff] %v145_v41 }
  0x52   :  { %274 = vst [vmem:[#allocation7 + $0x4d0] sm:$0xff] %v146_v42  ;;  %275 = vst [vmem:[#allocation7 + $0x4d8] sm:$0xff] %v147_v43  ;;  %v148_v44 = vld [vmem:[#allocation2 + $0x360] sm:$0xff]  ;;  %v149_v45 = vld [vmem:[#allocation2 + $0x368] sm:$0xff] }
  0x53   :  { %v150_v46 = vld [vmem:[#allocation2 + $0x370] sm:$0xff]  ;;  %276 = vst [vmem:[#allocation7 + $0x4e0] sm:$0xff] %v148_v44  ;;  %277 = vst [vmem:[#allocation7 + $0x4e8] sm:$0xff] %v149_v45  ;;  %v151_v47 = vld [vmem:[#allocation2 + $0x378] sm:$0xff] }
  0x54   :  { %278 = vst [vmem:[#allocation7 + $0x4f0] sm:$0xff] %v150_v46  ;;  %v152_v48 = vld [vmem:[#allocation2 + $0x380] sm:$0xff]  ;;  %v153_v49 = vld [vmem:[#allocation2 + $0x388] sm:$0xff]  ;;  %279 = vst [vmem:[#allocation7 + $0x4f8] sm:$0xff] %v151_v47 }
  0x55   :  { %280 = vst [vmem:[#allocation7 + $0x540] sm:$0xff] %v152_v48  ;;  %281 = vst [vmem:[#allocation7 + $0x548] sm:$0xff] %v153_v49  ;;  %v154_v50 = vld [vmem:[#allocation2 + $0x390] sm:$0xff]  ;;  %v155_v51 = vld [vmem:[#allocation2 + $0x398] sm:$0xff] }
  0x56   :  { %v156_v52 = vld [vmem:[#allocation2 + $0x3a0] sm:$0xff]  ;;  %282 = vst [vmem:[#allocation7 + $0x550] sm:$0xff] %v154_v50  ;;  %283 = vst [vmem:[#allocation7 + $0x558] sm:$0xff] %v155_v51  ;;  %v157_v53 = vld [vmem:[#allocation2 + $0x3a8] sm:$0xff] }
  0x57   :  { %284 = vst [vmem:[#allocation7 + $0x560] sm:$0xff] %v156_v52  ;;  %v158_v54 = vld [vmem:[#allocation2 + $0x3b0] sm:$0xff]  ;;  %v159_v55 = vld [vmem:[#allocation2 + $0x3b8] sm:$0xff]  ;;  %285 = vst [vmem:[#allocation7 + $0x568] sm:$0xff] %v157_v53 }
  0x58   :  { %286 = vst [vmem:[#allocation7 + $0x570] sm:$0xff] %v158_v54  ;;  %287 = vst [vmem:[#allocation7 + $0x578] sm:$0xff] %v159_v55  ;;  %v160_v56 = vld [vmem:[#allocation2 + $0x3c0] sm:$0xff]  ;;  %v161_v57 = vld [vmem:[#allocation2 + $0x3c8] sm:$0xff] }
  0x59   :  { %v162_v58 = vld [vmem:[#allocation2 + $0x3d0] sm:$0xff]  ;;  %288 = vst [vmem:[#allocation7 + $0x580] sm:$0xff] %v160_v56  ;;  %289 = vst [vmem:[#allocation7 + $0x588] sm:$0xff] %v161_v57  ;;  %v163_v59 = vld [vmem:[#allocation2 + $0x3d8] sm:$0xff] }
  0x5a   :  { %290 = vst [vmem:[#allocation7 + $0x590] sm:$0xff] %v162_v58  ;;  %v164_v60 = vld [vmem:[#allocation2 + $0x3e0] sm:$0xff]  ;;  %v165_v61 = vld [vmem:[#allocation2 + $0x3e8] sm:$0xff]  ;;  %291 = vst [vmem:[#allocation7 + $0x598] sm:$0xff] %v163_v59 }
  0x5b   :  { %292 = vst [vmem:[#allocation7 + $0x5a0] sm:$0xff] %v164_v60  ;;  %293 = vst [vmem:[#allocation7 + $0x5a8] sm:$0xff] %v165_v61  ;;  %v166_v62 = vld [vmem:[#allocation2 + $0x3f0] sm:$0xff]  ;;  %v167_v63 = vld [vmem:[#allocation2 + $0x3f8] sm:$0xff] }
  0x5c   :  { %v296_v0 = vld [vmem:[#allocation5] sm:$0xff]  ;;  %294 = vst [vmem:[#allocation7 + $0x5b0] sm:$0xff] %v166_v62  ;;  %295 = vst [vmem:[#allocation7 + $0x5b8] sm:$0xff] %v167_v63  ;;  %v297_v1 = vld [vmem:[#allocation5 + $0x8] sm:$0xff] }
  0x5d   :  { %360 = vst [vmem:[#allocation7 + $0x80] sm:$0xff] %v296_v0  ;;  %v298_v2 = vld [vmem:[#allocation5 + $0x10] sm:$0xff]  ;;  %v299_v3 = vld [vmem:[#allocation5 + $0x18] sm:$0xff]  ;;  %361 = vst [vmem:[#allocation7 + $0x88] sm:$0xff] %v297_v1 }
  0x5e   :  { %362 = vst [vmem:[#allocation7 + $0x90] sm:$0xff] %v298_v2  ;;  %363 = vst [vmem:[#allocation7 + $0x98] sm:$0xff] %v299_v3  ;;  %v300_v4 = vld [vmem:[#allocation5 + $0x20] sm:$0xff]  ;;  %v301_v5 = vld [vmem:[#allocation5 + $0x28] sm:$0xff] }
  0x5f   :  { %v302_v6 = vld [vmem:[#allocation5 + $0x30] sm:$0xff]  ;;  %364 = vst [vmem:[#allocation7 + $0xa0] sm:$0xff] %v300_v4  ;;  %365 = vst [vmem:[#allocation7 + $0xa8] sm:$0xff] %v301_v5  ;;  %v303_v7 = vld [vmem:[#allocation5 + $0x38] sm:$0xff] }
  0x60   :  { %366 = vst [vmem:[#allocation7 + $0xb0] sm:$0xff] %v302_v6  ;;  %v304_v8 = vld [vmem:[#allocation5 + $0x40] sm:$0xff]  ;;  %v305_v9 = vld [vmem:[#allocation5 + $0x48] sm:$0xff]  ;;  %367 = vst [vmem:[#allocation7 + $0xb8] sm:$0xff] %v303_v7 }
  0x61   :  { %368 = vst [vmem:[#allocation7 + $0x140] sm:$0xff] %v304_v8  ;;  %369 = vst [vmem:[#allocation7 + $0x148] sm:$0xff] %v305_v9  ;;  %v306_v10 = vld [vmem:[#allocation5 + $0x50] sm:$0xff]  ;;  %v307_v11 = vld [vmem:[#allocation5 + $0x58] sm:$0xff] }
  0x62   :  { %v308_v12 = vld [vmem:[#allocation5 + $0x60] sm:$0xff]  ;;  %370 = vst [vmem:[#allocation7 + $0x150] sm:$0xff] %v306_v10  ;;  %371 = vst [vmem:[#allocation7 + $0x158] sm:$0xff] %v307_v11  ;;  %v309_v13 = vld [vmem:[#allocation5 + $0x68] sm:$0xff] }
  0x63   :  { %372 = vst [vmem:[#allocation7 + $0x160] sm:$0xff] %v308_v12  ;;  %v310_v14 = vld [vmem:[#allocation5 + $0x70] sm:$0xff]  ;;  %v311_v15 = vld [vmem:[#allocation5 + $0x78] sm:$0xff]  ;;  %373 = vst [vmem:[#allocation7 + $0x168] sm:$0xff] %v309_v13 }
  0x64   :  { %374 = vst [vmem:[#allocation7 + $0x170] sm:$0xff] %v310_v14  ;;  %375 = vst [vmem:[#allocation7 + $0x178] sm:$0xff] %v311_v15  ;;  %v312_v16 = vld [vmem:[#allocation5 + $0x80] sm:$0xff]  ;;  %v313_v17 = vld [vmem:[#allocation5 + $0x88] sm:$0xff] }
  0x65   :  { %v314_v18 = vld [vmem:[#allocation5 + $0x90] sm:$0xff]  ;;  %376 = vst [vmem:[#allocation7 + $0x200] sm:$0xff] %v312_v16  ;;  %377 = vst [vmem:[#allocation7 + $0x208] sm:$0xff] %v313_v17  ;;  %v315_v19 = vld [vmem:[#allocation5 + $0x98] sm:$0xff] }
  0x66   :  { %378 = vst [vmem:[#allocation7 + $0x210] sm:$0xff] %v314_v18  ;;  %v316_v20 = vld [vmem:[#allocation5 + $0xa0] sm:$0xff]  ;;  %v317_v21 = vld [vmem:[#allocation5 + $0xa8] sm:$0xff]  ;;  %379 = vst [vmem:[#allocation7 + $0x218] sm:$0xff] %v315_v19 }
  0x67   :  { %380 = vst [vmem:[#allocation7 + $0x220] sm:$0xff] %v316_v20  ;;  %381 = vst [vmem:[#allocation7 + $0x228] sm:$0xff] %v317_v21  ;;  %v318_v22 = vld [vmem:[#allocation5 + $0xb0] sm:$0xff]  ;;  %v319_v23 = vld [vmem:[#allocation5 + $0xb8] sm:$0xff] }
  0x68   :  { %v320_v24 = vld [vmem:[#allocation5 + $0xc0] sm:$0xff]  ;;  %382 = vst [vmem:[#allocation7 + $0x230] sm:$0xff] %v318_v22  ;;  %383 = vst [vmem:[#allocation7 + $0x238] sm:$0xff] %v319_v23  ;;  %v321_v25 = vld [vmem:[#allocation5 + $0xc8] sm:$0xff] }
  0x69   :  { %384 = vst [vmem:[#allocation7 + $0x2c0] sm:$0xff] %v320_v24  ;;  %v322_v26 = vld [vmem:[#allocation5 + $0xd0] sm:$0xff]  ;;  %v323_v27 = vld [vmem:[#allocation5 + $0xd8] sm:$0xff]  ;;  %385 = vst [vmem:[#allocation7 + $0x2c8] sm:$0xff] %v321_v25 }
  0x6a   :  { %386 = vst [vmem:[#allocation7 + $0x2d0] sm:$0xff] %v322_v26  ;;  %387 = vst [vmem:[#allocation7 + $0x2d8] sm:$0xff] %v323_v27  ;;  %v324_v28 = vld [vmem:[#allocation5 + $0xe0] sm:$0xff]  ;;  %v325_v29 = vld [vmem:[#allocation5 + $0xe8] sm:$0xff] }
  0x6b   :  { %v326_v30 = vld [vmem:[#allocation5 + $0xf0] sm:$0xff]  ;;  %388 = vst [vmem:[#allocation7 + $0x2e0] sm:$0xff] %v324_v28  ;;  %389 = vst [vmem:[#allocation7 + $0x2e8] sm:$0xff] %v325_v29  ;;  %v327_v31 = vld [vmem:[#allocation5 + $0xf8] sm:$0xff] }
  0x6c   :  { %390 = vst [vmem:[#allocation7 + $0x2f0] sm:$0xff] %v326_v30  ;;  %v328_v32 = vld [vmem:[#allocation5 + $0x100] sm:$0xff]  ;;  %v329_v33 = vld [vmem:[#allocation5 + $0x108] sm:$0xff]  ;;  %391 = vst [vmem:[#allocation7 + $0x2f8] sm:$0xff] %v327_v31 }
  0x6d   :  { %392 = vst [vmem:[#allocation7 + $0x380] sm:$0xff] %v328_v32  ;;  %393 = vst [vmem:[#allocation7 + $0x388] sm:$0xff] %v329_v33  ;;  %v330_v34 = vld [vmem:[#allocation5 + $0x110] sm:$0xff]  ;;  %v331_v35 = vld [vmem:[#allocation5 + $0x118] sm:$0xff] }
  0x6e   :  { %v332_v36 = vld [vmem:[#allocation5 + $0x120] sm:$0xff]  ;;  %394 = vst [vmem:[#allocation7 + $0x390] sm:$0xff] %v330_v34  ;;  %395 = vst [vmem:[#allocation7 + $0x398] sm:$0xff] %v331_v35  ;;  %v333_v37 = vld [vmem:[#allocation5 + $0x128] sm:$0xff] }
  0x6f   :  { %396 = vst [vmem:[#allocation7 + $0x3a0] sm:$0xff] %v332_v36  ;;  %v334_v38 = vld [vmem:[#allocation5 + $0x130] sm:$0xff]  ;;  %v335_v39 = vld [vmem:[#allocation5 + $0x138] sm:$0xff]  ;;  %397 = vst [vmem:[#allocation7 + $0x3a8] sm:$0xff] %v333_v37 }
  0x70   :  { %398 = vst [vmem:[#allocation7 + $0x3b0] sm:$0xff] %v334_v38  ;;  %399 = vst [vmem:[#allocation7 + $0x3b8] sm:$0xff] %v335_v39  ;;  %v336_v40 = vld [vmem:[#allocation5 + $0x140] sm:$0xff]  ;;  %v337_v41 = vld [vmem:[#allocation5 + $0x148] sm:$0xff] }
  0x71   :  { %v338_v42 = vld [vmem:[#allocation5 + $0x150] sm:$0xff]  ;;  %400 = vst [vmem:[#allocation7 + $0x440] sm:$0xff] %v336_v40  ;;  %401 = vst [vmem:[#allocation7 + $0x448] sm:$0xff] %v337_v41  ;;  %v339_v43 = vld [vmem:[#allocation5 + $0x158] sm:$0xff] }
  0x72   :  { %402 = vst [vmem:[#allocation7 + $0x450] sm:$0xff] %v338_v42  ;;  %v340_v44 = vld [vmem:[#allocation5 + $0x160] sm:$0xff]  ;;  %v341_v45 = vld [vmem:[#allocation5 + $0x168] sm:$0xff]  ;;  %403 = vst [vmem:[#allocation7 + $0x458] sm:$0xff] %v339_v43 }
  0x73   :  { %404 = vst [vmem:[#allocation7 + $0x460] sm:$0xff] %v340_v44  ;;  %405 = vst [vmem:[#allocation7 + $0x468] sm:$0xff] %v341_v45  ;;  %v342_v46 = vld [vmem:[#allocation5 + $0x170] sm:$0xff]  ;;  %v343_v47 = vld [vmem:[#allocation5 + $0x178] sm:$0xff] }
  0x74   :  { %v344_v48 = vld [vmem:[#allocation5 + $0x180] sm:$0xff]  ;;  %406 = vst [vmem:[#allocation7 + $0x470] sm:$0xff] %v342_v46  ;;  %407 = vst [vmem:[#allocation7 + $0x478] sm:$0xff] %v343_v47  ;;  %v345_v49 = vld [vmem:[#allocation5 + $0x188] sm:$0xff] }
  0x75   :  { %408 = vst [vmem:[#allocation7 + $0x500] sm:$0xff] %v344_v48  ;;  %v346_v50 = vld [vmem:[#allocation5 + $0x190] sm:$0xff]  ;;  %v347_v51 = vld [vmem:[#allocation5 + $0x198] sm:$0xff]  ;;  %409 = vst [vmem:[#allocation7 + $0x508] sm:$0xff] %v345_v49 }
  0x76   :  { %410 = vst [vmem:[#allocation7 + $0x510] sm:$0xff] %v346_v50  ;;  %411 = vst [vmem:[#allocation7 + $0x518] sm:$0xff] %v347_v51  ;;  %v348_v52 = vld [vmem:[#allocation5 + $0x1a0] sm:$0xff]  ;;  %v349_v53 = vld [vmem:[#allocation5 + $0x1a8] sm:$0xff] }
  0x77   :  { %v350_v54 = vld [vmem:[#allocation5 + $0x1b0] sm:$0xff]  ;;  %412 = vst [vmem:[#allocation7 + $0x520] sm:$0xff] %v348_v52  ;;  %413 = vst [vmem:[#allocation7 + $0x528] sm:$0xff] %v349_v53  ;;  %v351_v55 = vld [vmem:[#allocation5 + $0x1b8] sm:$0xff] }
  0x78   :  { %414 = vst [vmem:[#allocation7 + $0x530] sm:$0xff] %v350_v54  ;;  %v352_v56 = vld [vmem:[#allocation5 + $0x1c0] sm:$0xff]  ;;  %v353_v57 = vld [vmem:[#allocation5 + $0x1c8] sm:$0xff]  ;;  %415 = vst [vmem:[#allocation7 + $0x538] sm:$0xff] %v351_v55 }
  0x79   :  { %416 = vst [vmem:[#allocation7 + $0x5c0] sm:$0xff] %v352_v56  ;;  %417 = vst [vmem:[#allocation7 + $0x5c8] sm:$0xff] %v353_v57  ;;  %v354_v58 = vld [vmem:[#allocation5 + $0x1d0] sm:$0xff]  ;;  %v355_v59 = vld [vmem:[#allocation5 + $0x1d8] sm:$0xff] }
  0x7a   :  { %v356_v60 = vld [vmem:[#allocation5 + $0x1e0] sm:$0xff]  ;;  %418 = vst [vmem:[#allocation7 + $0x5d0] sm:$0xff] %v354_v58  ;;  %419 = vst [vmem:[#allocation7 + $0x5d8] sm:$0xff] %v355_v59  ;;  %v357_v61 = vld [vmem:[#allocation5 + $0x1e8] sm:$0xff] }
  0x7b   :  { %420 = vst [vmem:[#allocation7 + $0x5e0] sm:$0xff] %v356_v60  ;;  %v358_v62 = vld [vmem:[#allocation5 + $0x1f0] sm:$0xff]  ;;  %v359_v63 = vld [vmem:[#allocation5 + $0x1f8] sm:$0xff]  ;;  %421 = vst [vmem:[#allocation7 + $0x5e8] sm:$0xff] %v357_v61 }
  0x7c   :  { %422 = vst [vmem:[#allocation7 + $0x5f0] sm:$0xff] %v358_v62  ;;  %423 = vst [vmem:[#allocation7 + $0x5f8] sm:$0xff] %v359_v63 }
  0x7d   :  { %498 = shalt.err (!%p495_p0)
}
  0x7e   :  { %435 = dma.vmem_to_hbm [thread:$0]  %s430_s1, 24576, %s553_s2, [#allocation4], %s514_s12, %s514_s12, %s515_s13  }
  0x7f   :  { %511 = dma.done.wait [#allocation4], 24576  }
  0x80   :  { %512 = vsyncadd [#allocation4], 4294942720 }
  0x81   :  { %439 = vsyncpa [#allocation3], 1 }
  0x82   :  { %440 = vsyncpa [#allocation6], 1 }
  0x83   :  { %441 = vsyncpa [#allocation4], 1 }

// kernel: tpu_custom_call.1
= control target key start
LH: loop header
LB: loop body
LE: loop exit
PB: predicated region body
PF: predicated region fallthrough
CT: control target
= control target key end

     0   :  { %vm32_vm0 = vcmask 1041408   ;;  %vm35_vm1 = vcmask 1045508   ;;  %vm33_vm2 = vsmask.f32 1280  ;;  %vm36_vm3 = vsmask.f32 5376  ;;  %s157_s0 = inlined_call_operand.vmem [shape: bf16[2,3,256], index: 0, kind: input, shape index: {}]   ;;  %s158_s1 = inlined_call_operand.vmem [shape: bf16[2,5,256], index: 1, kind: input, shape index: {}]   ;;  %s159_s2 = inlined_call_operand.hbm [shape: bf16[2,8,256], index: 2, kind: output, shape index: {}]  }
   0x1   :  { %v94_v0 = vld.sshfl [vmem:[%s157_s0] sm:$0x33 pattern:$0x76325410]  ;;  %vm34_vm4 = vmand %vm32_vm0, %vm33_vm2  ;;  %v42_v3 = vld [vmem:[#allocation2 + $0x8] sm:$0x33] }
   0x2   :  { %v39_v1 = vld [vmem:[#allocation2] sm:$0x33]  ;;  %vm37_vm5 = vmand %vm35_vm1, %vm36_vm3  ;;  %vm65_vm6 = vcmask 1043457   ;;  %vm66_vm7 = vsmask.f32 7942  ;;  %vm68_vm8 = vcmask 1047557  }
   0x3   :  { %v95_v2 = vld.sshfl [vmem:[%s157_s0 + $0x4] sm:$0x33 pattern:$0x76325410]  ;;  %vm38_vm9 = vmor %vm37_vm5, %vm34_vm4  ;;  %vm69_vm10 = vsmask.f32 7958 }
   0x4   :  { %v45_v4 = vld [vmem:[%s158_s1] sm:$0x77]  ;;  %v46_v7 = vld [vmem:[%s158_s1 + $0x8] sm:$0x77]  ;;  %v40_v8 = vsel %vm38_vm9, %v94_v0, %v39_v1  ;;  %v43_v9 = vsel %vm38_vm9, %v95_v2, %v42_v3  ;;  %vm67_vm11 = vmand %vm65_vm6, %vm66_vm7 }
   0x5   :  { %v48_v5 = vshrl.u32 %v45_v4, 16  ;;  %v51_v6 = vshll.u32 %v45_v4, 16  ;;  %v56_v10 = vshrl.u32 %v46_v7, 16  ;;  %v59_v11 = vshll.u32 %v46_v7, 16  ;;  %41 = vst [vmem:[#allocation2] sm:$0x33] %v40_v8  ;;  %vm70_vm12 = vmand %vm68_vm8, %vm69_vm10 }
   0x6   :  { %44 = vst [vmem:[#allocation2 + $0x8] sm:$0x33] %v43_v9 }
   0x7   :  { %v50_v12 = vrot.slane %v48_v5, 6  ;;  %v53_v13 = vrot.slane %v51_v6, 7  ;;  %v58_v14 = vrot.slane %v56_v10, 6  ;;  %v61_v15 = vrot.slane %v59_v11, 7 }
   0x8   :  { %7 = vsyncpa [#allocation3], 0  ;;  %s121_s0 = smov [#allocation2]  }
   0x9   :  { %v54_v16 = vor.u32 %v53_v13, %v50_v12  ;;  %v62_v17 = vor.u32 %v61_v15, %v58_v14  ;;  %s83_s1 = sshll.u32 %s121_s0, 4  ;;  %vm71_vm13 = vmor %vm70_vm12, %vm67_vm11  ;;  %s84_s1 = int_to_ptr.vmem [resolvable:$true] %s83_s1 }
   0xa   :  { %s99_s17 = scalar_lea.vmem %s84_s1, 256  ;;  %p104_p1 = scmp.lt.s32.totalorder %s84_s1, %s84_s1 }
   0xb   :  { %p100_p0 = scmp.ne.s32.totalorder %s84_s1, %s99_s17  ;;  %p105_p2 = scmp.lt.s32.totalorder %s99_s17, %s99_s17 }
   0xc   :  { %v72_v18 = vld [vmem:[#allocation2] sm:$0xee] }
   0xd   :  { %v75_v19 = vld [vmem:[#allocation2 + $0x8] sm:$0xee]  ;;  %v73_v20 = vsel %vm71_vm13, %v54_v16, %v72_v18  ;;  %p106_p3 = por %p105_p2, %p104_p1 }
   0xe   :  { %v76_v21 = vsel %vm71_vm13, %v62_v17, %v75_v19  ;;  %74 = vst [vmem:[#allocation2] sm:$0xee] %v73_v20 }
   0xf   :  { %77 = vst [vmem:[#allocation2 + $0x8] sm:$0xee] %v76_v21  ;;  %p107_p4 = pnand %p106_p3, %p100_p0 }
  0x11   :  { %110 = shalt.err (!%p107_p4)
}
  0x12   :  { %s122_s18 = smov 128   ;;  %s123_s19 = smov 8  }
  0x13   :  { %89 = dma.vmem_to_hbm [thread:$0]  %s84_s1, 256, %s159_s2, [#allocation3], %s122_s18, %s122_s18, %s123_s19  }
  0x14   :  { %119 = dma.done.wait [#allocation3], 256  }
  0x15   :  { %120 = vsyncadd [#allocation3], 4294967040 }
  0x16   :  { %93 = vsyncpa [#allocation3], 1 }

// kernel: tpu_custom_call.1
= control target key start
LH: loop header
LB: loop body
LE: loop exit
PB: predicated region body
PF: predicated region fallthrough
CT: control target
= control target key end

     0   :  { %v58_v0 = vlaneseq  ;;  %v91_v4 = vmov 1983009808   ;;  %s172_s0 = inlined_call_operand.vmem [shape: f32[2,4,256], index: 0, kind: input, shape index: {}]   ;;  %s173_s3 = inlined_call_operand.vmem [shape: f32[2,12,256], index: 3, kind: output, shape index: {}]   ;;  %s174_s1 = inlined_call_operand.vmem [shape: f32[2,6,256], index: 1, kind: input, shape index: {}]   ;;  %s175_s2 = inlined_call_operand.vmem [shape: f32[2,2,256], index: 2, kind: input, shape index: {}]  }
   0x1   :  { %v14_v1 = vld [vmem:[%s172_s0] sm:$0xff]  ;;  %v15_v2 = vld [vmem:[%s172_s0 + $0x8] sm:$0xff]  ;;  %v56_v5 = vunpack.c.l.s4 %v91_v4  ;;  %v28_v10 = vld [vmem:[%s174_s1 + $0x10] sm:$0x3f] }
   0x2   :  { %v26_v3 = vld [vmem:[%s174_s1] sm:$0x3f]  ;;  %22 = vst [vmem:[%s173_s3] sm:$0xf] %v14_v1  ;;  %v18_v6 = vcombine.high %v14_v1, %v14_v1  ;;  %24 = vst [vmem:[%s173_s3 + $0x20] sm:$0xf] %v15_v2  ;;  %v19_v7 = vcombine.high %v15_v2, %v15_v2  ;;  %v59_v11 = vshrl.u32 %v58_v0, 7 }
   0x3   :  { %v34_v8 = vrot.slane %v26_v3, 4  ;;  %v27_v9 = vld [vmem:[%s174_s1 + $0x8] sm:$0x3f]  ;;  %v36_v13 = vrot.slane %v28_v10, 4  ;;  %v29_v14 = vld [vmem:[%s174_s1 + $0x18] sm:$0x3f]  ;;  %v57_v15 = vunpack.c.0.s8 %v56_v5 }
   0x4   :  { %v35_v12 = vrot.slane %v27_v9, 4  ;;  %23 = vst [vmem:[%s173_s3 + $0x8] sm:$0xf] %v18_v6  ;;  %25 = vst [vmem:[%s173_s3 + $0x28] sm:$0xf] %v19_v7  ;;  %v37_v16 = vrot.slane %v29_v14, 4 }
   0x5   :  { %42 = vst [vmem:[%s173_s3 + $0x10] ss:$-12 sps:$4 sm:$0xf3] %v34_v8   ;;  %v89_v17 = vld [vmem:[%s175_s2] ss:$0 sps:$4 sm:$0xff]   ;;  %v60_v18 = vsub.s32 %v57_v15, %v59_v11 }
   0x6   :  { %43 = vst [vmem:[%s173_s3 + $0x18] ss:$-12 sps:$4 sm:$0xf3] %v35_v12   ;;  %46 = vst [vmem:[%s173_s3 + $0x30] ss:$-12 sps:$4 sm:$0xf3] %v36_v13  }
   0x7   :  { %v90_v19 = vld [vmem:[%s175_s2 + $0x4] ss:$0 sps:$4 sm:$0xff]   ;;  %47 = vst [vmem:[%s173_s3 + $0x38] ss:$-12 sps:$4 sm:$0xf3] %v37_v16   ;;  %v61_v20 = vrot.slane %v89_v17, %v60_v18 }
   0x8   :  { %84 = vst.sshfl [vmem:[%s173_s3 + $0x10] sm:$0x30 pattern:$0x76325410] %v89_v17  ;;  %v70_v21 = vrot.slane %v90_v19, %v60_v18 }
   0x9   :  { %85 = vst.sshfl [vmem:[%s173_s3 + $0x30] sm:$0x30 pattern:$0x76325410] %v90_v19  ;;  %v62_v22 = vcombine.high %v61_v20, %v61_v20 }
   0xa   :  { %v71_v23 = vcombine.high %v70_v21, %v70_v21 }
   0xb   :  { %77 = vst [vmem:[%s173_s3 + $0x18] sm:$0xc] %v62_v22 }
   0xc   :  { %79 = vst [vmem:[%s173_s3 + $0x38] sm:$0xc] %v71_v23 }

</bundles_post_ra>
